<compile_context>
chip_gen: v5e
topology: v5e:2x2
jax: 0.10.0
libtpu: 0.0.40
codegen_flags: <defaults>
</compile_context>

<pallas_src>
import jax
import jax.numpy as jnp
from jax import lax
from jax.experimental import pallas as pl
from jax.experimental.pallas import tpu as pltpu

# ----- small synthetic CLIP config -----
VOCAB = 64     # vocab size (EOT token = VOCAB-1, the highest id -> argmax finds it)
CTX = 8        # context length L
WIDTH = 32     # transformer width D
HEADS = 4
HEAD_DIM = WIDTH // HEADS
LAYERS = 2
EMBED = 16     # text_projection output dim
OUT_PAD = 128  # lane-dense padded output width
BATCH = 2


def _layernorm(v, w, b, eps=1e-5):
    mu = jnp.mean(v, axis=-1, keepdims=True)
    var = jnp.mean((v - mu) ** 2, axis=-1, keepdims=True)
    return (v - mu) * lax.rsqrt(var + eps) * w + b


# ---------------------------------------------------------------------------
# Single fused kernel: embedding -> LAYERS x residual block -> ln_final ->
# EOT gather -> text_projection.  One batch element per grid step.
# ---------------------------------------------------------------------------
def clip_text_kernel(tok_ref, emb_ref, pos_ref,
                     ln1w, ln1b, wq, bq, wk, bk, wv, bv, wo, bo,
                     ln2w, ln2b, w1, b1, w2, b2, lnfw, lnfb, proj,
                     out_ref):
    L, D, H, HD = CTX, WIDTH, HEADS, HEAD_DIM
    scale = 1.0 / (HD ** 0.5)

    # --- token embedding as a one-hot matmul (MXU) + positional embedding ---
    tok = tok_ref[0]                                                # (L, 1) int32
    onehot = (tok == lax.broadcasted_iota(jnp.int32, (L, VOCAB), 1)).astype(jnp.float32)
    x = jnp.dot(onehot, emb_ref[...],
                preferred_element_type=jnp.float32) + pos_ref[...]  # (L, D) f32

    # additive causal mask, built once (finite large negative; diagonal never masked)
    r = lax.broadcasted_iota(jnp.int32, (L, L), 0)
    c = lax.broadcasted_iota(jnp.int32, (L, L), 1)
    neg = jnp.where(c > r, -1e30, 0.0).astype(jnp.float32)[None]    # (1, L, L)

    def layer_step(l, x):
        # --- pre-LN multi-head causal self-attention ---
        h = _layernorm(x, ln1w[l], ln1b[l]).astype(jnp.bfloat16)
        q = jnp.dot(h, wq[l], preferred_element_type=jnp.float32) + bq[l]
        k = jnp.dot(h, wk[l], preferred_element_type=jnp.float32) + bk[l]
        v = jnp.dot(h, wv[l], preferred_element_type=jnp.float32) + bv[l]
        q3 = q.reshape(L, H, HD)
        k3 = k.reshape(L, H, HD)
        v3 = v.reshape(L, H, HD)
        s = jnp.einsum('qhd,khd->hqk', q3, k3,
                       preferred_element_type=jnp.float32) * scale + neg
        p = jax.nn.softmax(s, axis=-1)
        o = jnp.einsum('hqk,khd->qhd', p, v3,
                       preferred_element_type=jnp.float32).reshape(L, D)
        x = x + jnp.dot(o.astype(jnp.bfloat16), wo[l],
                        preferred_element_type=jnp.float32) + bo[l]

        # --- pre-LN MLP with QuickGELU (elementwise stays f32) ---
        h2 = _layernorm(x, ln2w[l], ln2b[l]).astype(jnp.bfloat16)
        m = jnp.dot(h2, w1[l], preferred_element_type=jnp.float32) + b1[l]
        m = m * jax.nn.sigmoid(1.702 * m)
        x = x + jnp.dot(m.astype(jnp.bfloat16), w2[l],
                        preferred_element_type=jnp.float32) + b2[l]
        return x

    x = lax.fori_loop(0, LAYERS, layer_step, x, unroll=True)

    # --- EOT row (first occurrence of max token id) -> ln_final -> projection ---
    pos_i = lax.broadcasted_iota(jnp.int32, (L, 1), 0)
    tokmax = jnp.max(tok, axis=0, keepdims=True)                    # (1, 1)
    eot = jnp.min(jnp.where(tok == tokmax, pos_i, L), axis=0, keepdims=True)
    sel = (pos_i == eot).astype(jnp.float32)                        # (L, 1)
    row = jnp.sum(x * sel, axis=0, keepdims=True)                   # (1, D)
    row = _layernorm(row, lnfw[...], lnfb[...]).astype(jnp.bfloat16)
    out_ref[0] = jnp.dot(row, proj[...],
                         preferred_element_type=jnp.float32)        # (1, 128) lane-dense


# ---------------------------------------------------------------------------
# Host-side one-time parameter prep: pre-transpose to [in, out], split QKV,
# stack per-layer weights along a leading layer axis, bf16 for MXU operands,
# lane-pad the text projection.
# ---------------------------------------------------------------------------
def prepare_params(params):
    D = WIDTH
    blks = params['blocks']
    bf = jnp.bfloat16

    def stk(fn, dtype=jnp.float32):
        return jnp.stack([fn(b).astype(dtype) for b in blks], axis=0)

    proj_pad = jnp.zeros((D, OUT_PAD), bf).at[:, :EMBED].set(
        params['text_projection'].astype(bf))

    return [
        params['token_embedding'].astype(jnp.float32),   # (VOCAB, D) exact one-hot gather
        params['positional_embedding'].astype(jnp.float32),  # (CTX, D)
        stk(lambda b: b[0]), stk(lambda b: b[1]),         # ln1 w, b       (LAYERS,1,D)
        stk(lambda b: b[2][:D, :].T, bf),                 # Wq^T           (LAYERS,D,D)
        stk(lambda b: b[3][:, :D]),                       # bq             (LAYERS,1,D)
        stk(lambda b: b[2][D:2 * D, :].T, bf),            # Wk^T
        stk(lambda b: b[3][:, D:2 * D]),                  # bk
        stk(lambda b: b[2][2 * D:, :].T, bf),             # Wv^T
        stk(lambda b: b[3][:, 2 * D:]),                   # bv
        stk(lambda b: b[4].T, bf),                        # Wo^T           (LAYERS,D,D)
        stk(lambda b: b[5]),                              # bo
        stk(lambda b: b[6]), stk(lambda b: b[7]),         # ln2 w, b
        stk(lambda b: b[8].T, bf),                        # W1^T           (LAYERS,D,4D)
        stk(lambda b: b[9]),                              # b1             (LAYERS,1,4D)
        stk(lambda b: b[10].T, bf),                       # W2^T           (LAYERS,4D,D)
        stk(lambda b: b[11]),                             # b2
        params['ln_final_w'], params['ln_final_b'],       # (1, D)
        proj_pad,                                         # (D, 128) bf16
    ]


def encode_text(text, weights):
    bsz = text.shape[0]
    tok3 = text.astype(jnp.int32).reshape(bsz, CTX, 1)
    in_specs = [pl.BlockSpec((1, CTX, 1), lambda b: (b, 0, 0))]
    in_specs += [pl.BlockSpec(w.shape, lambda b, nd=w.ndim: (0,) * nd) for w in weights]
    out = pl.pallas_call(
        clip_text_kernel,
        out_shape=jax.ShapeDtypeStruct((bsz, 1, OUT_PAD), jnp.float32),
        grid_spec=pltpu.PrefetchScalarGridSpec(
            num_scalar_prefetch=0,
            grid=(bsz,),
            in_specs=in_specs,
            out_specs=pl.BlockSpec((1, 1, OUT_PAD), lambda b: (b, 0, 0))),
        compiler_params=pltpu.CompilerParams(dimension_semantics=("parallel",)),
    )(tok3, *weights)
    return out[:, 0, :EMBED]


# ---------------------------------------------------------------------------
# Parameters (deterministic synthetic init, PyTorch layout) and pure-JAX reference.
# ---------------------------------------------------------------------------
def init_params(key):
    def nrm(k, shape, s=0.02):
        return jax.random.normal(k, shape, dtype=jnp.float32) * s

    keys = jax.random.split(key, 4 + 12 * LAYERS)
    params = {
        'token_embedding': nrm(keys[0], (VOCAB, WIDTH)),
        'positional_embedding': nrm(keys[1], (CTX, WIDTH), 0.01),
        'ln_final_w': jnp.ones((1, WIDTH), jnp.float32),
        'ln_final_b': jnp.zeros((1, WIDTH), jnp.float32),
        'text_projection': nrm(keys[2], (WIDTH, EMBED)),
        'blocks': [],
    }
    kp = 4
    for _ in range(LAYERS):
        blk = (
            jnp.ones((1, WIDTH), jnp.float32),          # ln1 weight
            jnp.zeros((1, WIDTH), jnp.float32),         # ln1 bias
            nrm(keys[kp + 0], (3 * WIDTH, WIDTH)),      # in_proj_weight
            nrm(keys[kp + 1], (1, 3 * WIDTH)),          # in_proj_bias
            nrm(keys[kp + 2], (WIDTH, WIDTH)),          # out_proj weight
            nrm(keys[kp + 3], (1, WIDTH)),              # out_proj bias
            jnp.ones((1, WIDTH), jnp.float32),          # ln2 weight
            jnp.zeros((1, WIDTH), jnp.float32),         # ln2 bias
            nrm(keys[kp + 4], (4 * WIDTH, WIDTH)),      # mlp c_fc weight
            nrm(keys[kp + 5], (1, 4 * WIDTH)),          # mlp c_fc bias
            nrm(keys[kp + 6], (WIDTH, 4 * WIDTH)),      # mlp c_proj weight
            nrm(keys[kp + 7], (1, WIDTH)),              # mlp c_proj bias
        )
        params['blocks'].append(blk)
        kp += 8
    return params


def encode_text_ref(text, params):
    x = jnp.take(params['token_embedding'], text, axis=0)
    x = x + params['positional_embedding'][None]
    for (l1w, l1b, wqkv, bqkv, wo, bo, l2w, l2b, w1, b1, w2, b2) in params['blocks']:
        h = _layernorm(x, l1w[0], l1b[0])
        qkv = h @ wqkv.T + bqkv[0]
        q, k, v = jnp.split(qkv, 3, axis=-1)

        def heads(t):  # (B, L, D) -> (B, H, L, HD)
            return t.reshape(t.shape[0], CTX, HEADS, HEAD_DIM).transpose(0, 2, 1, 3)

        q, k, v = heads(q), heads(k), heads(v)
        s = jnp.einsum('bhqd,bhkd->bhqk', q, k) / (HEAD_DIM ** 0.5)
        mask = jnp.triu(jnp.ones((CTX, CTX), bool), k=1)
        s = jnp.where(mask, -jnp.inf, s)
        p = jax.nn.softmax(s, axis=-1)
        o = jnp.einsum('bhqk,bhkd->bhqd', p, v).transpose(0, 2, 1, 3).reshape(-1, CTX, WIDTH)
        x = x + (o @ wo.T + bo[0])
        h2 = _layernorm(x, l2w[0], l2b[0])
        m = h2 @ w1.T + b1[0]
        m = m * jax.nn.sigmoid(1.702 * m)
        x = x + (m @ w2.T + b2[0])
    x = _layernorm(x, params['ln_final_w'][0], params['ln_final_b'][0])
    eot = jnp.argmax(text, axis=-1)
    sel = x[jnp.arange(x.shape[0]), eot]
    return sel @ params['text_projection']


if __name__ == "__main__":
    key = jax.random.PRNGKey(0)
    kt, kp = jax.random.split(key)

    # TODO(synk): clip.tokenize (string -> token ids) and checkpoint loading have no
    #             Pallas equivalent; the kernel consumes integer token ids and synthetic
    #             deterministic weights directly.
    tokens = jax.random.randint(kt, (BATCH, CTX), 1, VOCAB - 2, dtype=jnp.int32)
    eot_pos = jnp.array([5, 7], dtype=jnp.int32)
    pos_ids = jnp.arange(CTX, dtype=jnp.int32)[None]
    tokens = jnp.where(pos_ids == eot_pos[:, None], VOCAB - 1, tokens)
    tokens = jnp.where(pos_ids > eot_pos[:, None], 0, tokens)

    params = init_params(kp)
    weights = prepare_params(params)

    out = encode_text(tokens, weights)
    out = jax.block_until_ready(out)

    ref = encode_text_ref(tokens, params)
    assert out.shape == (BATCH, EMBED)
    # bf16 MXU operands (f32 accumulation) vs the all-f32 reference -> relaxed tolerance.
    assert jnp.allclose(out, ref, atol=2e-2, rtol=2e-2), "mismatch vs JAX reference"

    print("KERNEL_OK")
</pallas_src>

<mosaic_0001>
module attributes {stable_mosaic.version = 11 : i64} {
  func.func @clip_text_kernel(%arg0: i32, %arg1: memref<1x8x1xi32, #tpu.memory_space<vmem>>, %arg2: memref<64x32xf32, #tpu.memory_space<vmem>>, %arg3: memref<8x32xf32, #tpu.memory_space<vmem>>, %arg4: memref<2x1x32xf32, #tpu.memory_space<vmem>>, %arg5: memref<2x1x32xf32, #tpu.memory_space<vmem>>, %arg6: memref<2x32x32xbf16, #tpu.memory_space<vmem>>, %arg7: memref<2x1x32xf32, #tpu.memory_space<vmem>>, %arg8: memref<2x32x32xbf16, #tpu.memory_space<vmem>>, %arg9: memref<2x1x32xf32, #tpu.memory_space<vmem>>, %arg10: memref<2x32x32xbf16, #tpu.memory_space<vmem>>, %arg11: memref<2x1x32xf32, #tpu.memory_space<vmem>>, %arg12: memref<2x32x32xbf16, #tpu.memory_space<vmem>>, %arg13: memref<2x1x32xf32, #tpu.memory_space<vmem>>, %arg14: memref<2x1x32xf32, #tpu.memory_space<vmem>>, %arg15: memref<2x1x32xf32, #tpu.memory_space<vmem>>, %arg16: memref<2x32x128xbf16, #tpu.memory_space<vmem>>, %arg17: memref<2x1x128xf32, #tpu.memory_space<vmem>>, %arg18: memref<2x128x32xbf16, #tpu.memory_space<vmem>>, %arg19: memref<2x1x32xf32, #tpu.memory_space<vmem>>, %arg20: memref<1x32xf32, #tpu.memory_space<vmem>>, %arg21: memref<1x32xf32, #tpu.memory_space<vmem>>, %arg22: memref<32x128xbf16, #tpu.memory_space<vmem>>, %arg23: memref<1x1x128xf32, #tpu.memory_space<vmem>>) attributes {dimension_semantics = [#tpu.dimension_semantics<parallel>], iteration_bounds = array<i64: 2>, scalar_prefetch = 0 : i64, scratch_operands = 0 : i64, tpu.core_type = #tpu.core_type<tc>, window_params = [{transform_indices = @transform_0, window_bounds = array<i64: 1, 8, 1>}, {pipeline_mode = #tpu.pipeline_mode<synchronous>, transform_indices = @transform_1, window_bounds = array<i64: 64, 32>}, {pipeline_mode = #tpu.pipeline_mode<synchronous>, transform_indices = @transform_2, window_bounds = array<i64: 8, 32>}, {pipeline_mode = #tpu.pipeline_mode<synchronous>, transform_indices = @transform_3, window_bounds = array<i64: 2, 1, 32>}, {pipeline_mode = #tpu.pipeline_mode<synchronous>, transform_indices = @transform_4, window_bounds = array<i64: 2, 1, 32>}, {pipeline_mode = #tpu.pipeline_mode<synchronous>, transform_indices = @transform_5, window_bounds = array<i64: 2, 32, 32>}, {pipeline_mode = #tpu.pipeline_mode<synchronous>, transform_indices = @transform_6, window_bounds = array<i64: 2, 1, 32>}, {pipeline_mode = #tpu.pipeline_mode<synchronous>, transform_indices = @transform_7, window_bounds = array<i64: 2, 32, 32>}, {pipeline_mode = #tpu.pipeline_mode<synchronous>, transform_indices = @transform_8, window_bounds = array<i64: 2, 1, 32>}, {pipeline_mode = #tpu.pipeline_mode<synchronous>, transform_indices = @transform_9, window_bounds = array<i64: 2, 32, 32>}, {pipeline_mode = #tpu.pipeline_mode<synchronous>, transform_indices = @transform_10, window_bounds = array<i64: 2, 1, 32>}, {pipeline_mode = #tpu.pipeline_mode<synchronous>, transform_indices = @transform_11, window_bounds = array<i64: 2, 32, 32>}, {pipeline_mode = #tpu.pipeline_mode<synchronous>, transform_indices = @transform_12, window_bounds = array<i64: 2, 1, 32>}, {pipeline_mode = #tpu.pipeline_mode<synchronous>, transform_indices = @transform_13, window_bounds = array<i64: 2, 1, 32>}, {pipeline_mode = #tpu.pipeline_mode<synchronous>, transform_indices = @transform_14, window_bounds = array<i64: 2, 1, 32>}, {pipeline_mode = #tpu.pipeline_mode<synchronous>, transform_indices = @transform_15, window_bounds = array<i64: 2, 32, 128>}, {pipeline_mode = #tpu.pipeline_mode<synchronous>, transform_indices = @transform_16, window_bounds = array<i64: 2, 1, 128>}, {pipeline_mode = #tpu.pipeline_mode<synchronous>, transform_indices = @transform_17, window_bounds = array<i64: 2, 128, 32>}, {pipeline_mode = #tpu.pipeline_mode<synchronous>, transform_indices = @transform_18, window_bounds = array<i64: 2, 1, 32>}, {pipeline_mode = #tpu.pipeline_mode<synchronous>, transform_indices = @transform_19, window_bounds = array<i64: 1, 32>}, {pipeline_mode = #tpu.pipeline_mode<synchronous>, transform_indices = @transform_20, window_bounds = array<i64: 1, 32>}, {pipeline_mode = #tpu.pipeline_mode<synchronous>, transform_indices = @transform_21, window_bounds = array<i64: 32, 128>}, {transform_indices = @transform_22, window_bounds = array<i64: 1, 1, 128>}]} {
    %c0 = arith.constant 0 : index
    %c0_0 = arith.constant 0 : index
    %c0_1 = arith.constant 0 : index
    %0 = vector.load %arg1[%c0, %c0_0, %c0_1] : memref<1x8x1xi32, #tpu.memory_space<vmem>>, vector<1x8x1xi32>
    %1 = vector.shape_cast %0 : vector<1x8x1xi32> to vector<8x1xi32>
    %2 = tpu.iota {dimensions = array<i32: 1>} : vector<8x64xi32>
    %3 = vector.broadcast %1 : vector<8x1xi32> to vector<8x64xi32>
    %4 = arith.cmpi eq, %3, %2 : vector<8x64xi32>
    %5 = arith.extui %4 : vector<8x64xi1> to vector<8x64xi32>
    %6 = arith.sitofp %5 : vector<8x64xi32> to vector<8x64xf32>
    %c0_2 = arith.constant 0 : index
    %c0_3 = arith.constant 0 : index
    %7 = vector.load %arg2[%c0_2, %c0_3] : memref<64x32xf32, #tpu.memory_space<vmem>>, vector<64x32xf32>
    %cst = arith.constant dense<0.000000e+00> : vector<8x32xf32>
    %8 = tpu.matmul %6, %7, %cst {dimension_numbers = #tpu.dot_dimension_numbers<[1], [0], [0], [1], [0, 0, 1, 1], [], []>} : vector<8x64xf32>, vector<64x32xf32>, vector<8x32xf32> -> vector<8x32xf32>
    %c0_4 = arith.constant 0 : index
    %c0_5 = arith.constant 0 : index
    %9 = vector.load %arg3[%c0_4, %c0_5] : memref<8x32xf32, #tpu.memory_space<vmem>>, vector<8x32xf32>
    %10 = arith.addf %8, %9 : vector<8x32xf32>
    %11 = tpu.iota {dimensions = array<i32: 0>} : vector<8x8xi32>
    %12 = tpu.iota {dimensions = array<i32: 1>} : vector<8x8xi32>
    %13 = arith.cmpi sgt, %12, %11 : vector<8x8xi32>
    %cst_6 = arith.constant -1.000000e+30 : f32
    %cst_7 = arith.constant 0.000000e+00 : f32
    %14 = vector.broadcast %cst_6 : f32 to vector<8x8xf32>
    %15 = vector.broadcast %cst_7 : f32 to vector<8x8xf32>
    %16 = arith.select %13, %14, %15 : vector<8x8xi1>, vector<8x8xf32>
    %17 = vector.shape_cast %16 : vector<8x8xf32> to vector<1x8x8xf32>
    %c0_i32 = arith.constant 0 : i32
    %18 = arith.index_cast %c0_i32 : i32 to index
    %c0_8 = arith.constant 0 : index
    %c0_9 = arith.constant 0 : index
    %19 = vector.load %arg4[%18, %c0_8, %c0_9] : memref<2x1x32xf32, #tpu.memory_space<vmem>>, vector<1x1x32xf32>
    %20 = vector.shape_cast %19 : vector<1x1x32xf32> to vector<1x32xf32>
    %21 = arith.index_cast %c0_i32 : i32 to index
    %c0_10 = arith.constant 0 : index
    %c0_11 = arith.constant 0 : index
    %22 = vector.load %arg5[%21, %c0_10, %c0_11] : memref<2x1x32xf32, #tpu.memory_space<vmem>>, vector<1x1x32xf32>
    %23 = vector.shape_cast %22 : vector<1x1x32xf32> to vector<1x32xf32>
    %cst_12 = arith.constant dense<0.000000e+00> : vector<8xf32>
    %24 = vector.multi_reduction <add>, %10, %cst_12 [1] : vector<8x32xf32> to vector<8xf32>
    %25 = vector.shape_cast %24 : vector<8xf32> to vector<8x1xf32>
    %cst_13 = arith.constant 3.200000e+01 : f32
    %26 = vector.broadcast %cst_13 : f32 to vector<8x1xf32>
    %27 = arith.divf %25, %26 : vector<8x1xf32>
    %28 = vector.broadcast %27 : vector<8x1xf32> to vector<8x32xf32>
    %29 = arith.subf %10, %28 : vector<8x32xf32>
    %30 = arith.mulf %29, %29 : vector<8x32xf32>
    %cst_14 = arith.constant dense<0.000000e+00> : vector<8xf32>
    %31 = vector.multi_reduction <add>, %30, %cst_14 [1] : vector<8x32xf32> to vector<8xf32>
    %32 = vector.shape_cast %31 : vector<8xf32> to vector<8x1xf32>
    %cst_15 = arith.constant 3.200000e+01 : f32
    %33 = vector.broadcast %cst_15 : f32 to vector<8x1xf32>
    %34 = arith.divf %32, %33 : vector<8x1xf32>
    %35 = vector.broadcast %27 : vector<8x1xf32> to vector<8x32xf32>
    %36 = arith.subf %10, %35 : vector<8x32xf32>
    %cst_16 = arith.constant 9.99999974E-6 : f32
    %37 = vector.broadcast %cst_16 : f32 to vector<8x1xf32>
    %38 = arith.addf %34, %37 : vector<8x1xf32>
    %39 = math.rsqrt %38 : vector<8x1xf32>
    %40 = vector.broadcast %39 : vector<8x1xf32> to vector<8x32xf32>
    %41 = arith.mulf %36, %40 : vector<8x32xf32>
    %42 = vector.broadcast %20 : vector<1x32xf32> to vector<8x32xf32>
    %43 = arith.mulf %41, %42 : vector<8x32xf32>
    %44 = vector.broadcast %23 : vector<1x32xf32> to vector<8x32xf32>
    %45 = arith.addf %43, %44 : vector<8x32xf32>
    %46 = arith.truncf %45 : vector<8x32xf32> to vector<8x32xbf16>
    %47 = arith.index_cast %c0_i32 : i32 to index
    %c0_17 = arith.constant 0 : index
    %c0_18 = arith.constant 0 : index
    %48 = vector.load %arg6[%47, %c0_17, %c0_18] : memref<2x32x32xbf16, #tpu.memory_space<vmem>>, vector<1x32x32xbf16>
    %49 = vector.shape_cast %48 : vector<1x32x32xbf16> to vector<32x32xbf16>
    %cst_19 = arith.constant dense<0.000000e+00> : vector<8x32xf32>
    %50 = tpu.matmul %46, %49, %cst_19 {dimension_numbers = #tpu.dot_dimension_numbers<[1], [0], [0], [1], [0, 0, 1, 1], [], []>} : vector<8x32xbf16>, vector<32x32xbf16>, vector<8x32xf32> -> vector<8x32xf32>
    %51 = arith.index_cast %c0_i32 : i32 to index
    %c0_20 = arith.constant 0 : index
    %c0_21 = arith.constant 0 : index
    %52 = vector.load %arg7[%51, %c0_20, %c0_21] : memref<2x1x32xf32, #tpu.memory_space<vmem>>, vector<1x1x32xf32>
    %53 = vector.shape_cast %52 : vector<1x1x32xf32> to vector<1x32xf32>
    %54 = vector.broadcast %53 : vector<1x32xf32> to vector<8x32xf32>
    %55 = arith.addf %50, %54 : vector<8x32xf32>
    %56 = arith.index_cast %c0_i32 : i32 to index
    %c0_22 = arith.constant 0 : index
    %c0_23 = arith.constant 0 : index
    %57 = vector.load %arg8[%56, %c0_22, %c0_23] : memref<2x32x32xbf16, #tpu.memory_space<vmem>>, vector<1x32x32xbf16>
    %58 = vector.shape_cast %57 : vector<1x32x32xbf16> to vector<32x32xbf16>
    %cst_24 = arith.constant dense<0.000000e+00> : vector<8x32xf32>
    %59 = tpu.matmul %46, %58, %cst_24 {dimension_numbers = #tpu.dot_dimension_numbers<[1], [0], [0], [1], [0, 0, 1, 1], [], []>} : vector<8x32xbf16>, vector<32x32xbf16>, vector<8x32xf32> -> vector<8x32xf32>
    %60 = arith.index_cast %c0_i32 : i32 to index
    %c0_25 = arith.constant 0 : index
    %c0_26 = arith.constant 0 : index
    %61 = vector.load %arg9[%60, %c0_25, %c0_26] : memref<2x1x32xf32, #tpu.memory_space<vmem>>, vector<1x1x32xf32>
    %62 = vector.shape_cast %61 : vector<1x1x32xf32> to vector<1x32xf32>
    %63 = vector.broadcast %62 : vector<1x32xf32> to vector<8x32xf32>
    %64 = arith.addf %59, %63 : vector<8x32xf32>
    %65 = arith.index_cast %c0_i32 : i32 to index
    %c0_27 = arith.constant 0 : index
    %c0_28 = arith.constant 0 : index
    %66 = vector.load %arg10[%65, %c0_27, %c0_28] : memref<2x32x32xbf16, #tpu.memory_space<vmem>>, vector<1x32x32xbf16>
    %67 = vector.shape_cast %66 : vector<1x32x32xbf16> to vector<32x32xbf16>
    %cst_29 = arith.constant dense<0.000000e+00> : vector<8x32xf32>
    %68 = tpu.matmul %46, %67, %cst_29 {dimension_numbers = #tpu.dot_dimension_numbers<[1], [0], [0], [1], [0, 0, 1, 1], [], []>} : vector<8x32xbf16>, vector<32x32xbf16>, vector<8x32xf32> -> vector<8x32xf32>
    %69 = arith.index_cast %c0_i32 : i32 to index
    %c0_30 = arith.constant 0 : index
    %c0_31 = arith.constant 0 : index
    %70 = vector.load %arg11[%69, %c0_30, %c0_31] : memref<2x1x32xf32, #tpu.memory_space<vmem>>, vector<1x1x32xf32>
    %71 = vector.shape_cast %70 : vector<1x1x32xf32> to vector<1x32xf32>
    %72 = vector.broadcast %71 : vector<1x32xf32> to vector<8x32xf32>
    %73 = arith.addf %68, %72 : vector<8x32xf32>
    %74 = vector.shape_cast %55 : vector<8x32xf32> to vector<8x4x8xf32>
    %75 = vector.shape_cast %64 : vector<8x32xf32> to vector<8x4x8xf32>
    %76 = vector.shape_cast %73 : vector<8x32xf32> to vector<8x4x8xf32>
    "tpu.trace_start"() <{level = 10 : i32, message = "qhd,khd->hqk"}> : () -> ()
    %cst_32 = arith.constant dense<0.000000e+00> : vector<4x8x8xf32>
    %77 = tpu.matmul %74, %75, %cst_32 {dimension_numbers = #tpu.dot_dimension_numbers<[2], [2], [0], [0], [0, 1, 0, 0, 1, 0], [1], [1]>} : vector<8x4x8xf32>, vector<8x4x8xf32>, vector<4x8x8xf32> -> vector<4x8x8xf32>
    "tpu.trace_stop"() : () -> ()
    %cst_33 = arith.constant 0.353553385 : f32
    %78 = vector.broadcast %cst_33 : f32 to vector<4x8x8xf32>
    %79 = arith.mulf %77, %78 : vector<4x8x8xf32>
    %80 = vector.broadcast %17 : vector<1x8x8xf32> to vector<4x8x8xf32>
    %81 = arith.addf %79, %80 : vector<4x8x8xf32>
    %cst_34 = arith.constant dense<0xFF800000> : vector<4x8xf32>
    %82 = vector.multi_reduction <maximumf>, %81, %cst_34 [2] : vector<4x8x8xf32> to vector<4x8xf32>
    %cst_35 = arith.constant 0xFF800000 : f32
    %83 = vector.broadcast %cst_35 : f32 to vector<4x8xf32>
    %84 = arith.maximumf %83, %82 : vector<4x8xf32>
    %85 = vector.shape_cast %84 : vector<4x8xf32> to vector<4x8x1xf32>
    %86 = vector.broadcast %85 : vector<4x8x1xf32> to vector<4x8x8xf32>
    %87 = arith.subf %81, %86 : vector<4x8x8xf32>
    %88 = math.exp %87 : vector<4x8x8xf32>
    %cst_36 = arith.constant dense<0.000000e+00> : vector<4x8xf32>
    %89 = vector.multi_reduction <add>, %88, %cst_36 [2] : vector<4x8x8xf32> to vector<4x8xf32>
    %90 = vector.shape_cast %89 : vector<4x8xf32> to vector<4x8x1xf32>
    %91 = vector.broadcast %90 : vector<4x8x1xf32> to vector<4x8x8xf32>
    %92 = arith.divf %88, %91 : vector<4x8x8xf32>
    "tpu.trace_start"() <{level = 10 : i32, message = "hqk,khd->qhd"}> : () -> ()
    %cst_37 = arith.constant dense<0.000000e+00> : vector<4x8x8xf32>
    %93 = tpu.matmul %76, %92, %cst_37 {dimension_numbers = #tpu.dot_dimension_numbers<[0], [2], [2], [1], [0, 1, 0, 2, 1, 1], [1], [0]>} : vector<8x4x8xf32>, vector<4x8x8xf32>, vector<4x8x8xf32> -> vector<4x8x8xf32>
    %94 = tpu.transpose %93, [2, 0, 1] : vector<4x8x8xf32> -> vector<8x4x8xf32>
    "tpu.trace_stop"() : () -> ()
    %95 = vector.shape_cast %94 : vector<8x4x8xf32> to vector<8x32xf32>
    %96 = arith.truncf %95 : vector<8x32xf32> to vector<8x32xbf16>
    %97 = arith.index_cast %c0_i32 : i32 to index
    %c0_38 = arith.constant 0 : index
    %c0_39 = arith.constant 0 : index
    %98 = vector.load %arg12[%97, %c0_38, %c0_39] : memref<2x32x32xbf16, #tpu.memory_space<vmem>>, vector<1x32x32xbf16>
    %99 = vector.shape_cast %98 : vector<1x32x32xbf16> to vector<32x32xbf16>
    %cst_40 = arith.constant dense<0.000000e+00> : vector<8x32xf32>
    %100 = tpu.matmul %96, %99, %cst_40 {dimension_numbers = #tpu.dot_dimension_numbers<[1], [0], [0], [1], [0, 0, 1, 1], [], []>} : vector<8x32xbf16>, vector<32x32xbf16>, vector<8x32xf32> -> vector<8x32xf32>
    %101 = arith.addf %10, %100 : vector<8x32xf32>
    %102 = arith.index_cast %c0_i32 : i32 to index
    %c0_41 = arith.constant 0 : index
    %c0_42 = arith.constant 0 : index
    %103 = vector.load %arg13[%102, %c0_41, %c0_42] : memref<2x1x32xf32, #tpu.memory_space<vmem>>, vector<1x1x32xf32>
    %104 = vector.shape_cast %103 : vector<1x1x32xf32> to vector<1x32xf32>
    %105 = vector.broadcast %104 : vector<1x32xf32> to vector<8x32xf32>
    %106 = arith.addf %101, %105 : vector<8x32xf32>
    %107 = arith.index_cast %c0_i32 : i32 to index
    %c0_43 = arith.constant 0 : index
    %c0_44 = arith.constant 0 : index
    %108 = vector.load %arg14[%107, %c0_43, %c0_44] : memref<2x1x32xf32, #tpu.memory_space<vmem>>, vector<1x1x32xf32>
    %109 = vector.shape_cast %108 : vector<1x1x32xf32> to vector<1x32xf32>
    %110 = arith.index_cast %c0_i32 : i32 to index
    %c0_45 = arith.constant 0 : index
    %c0_46 = arith.constant 0 : index
    %111 = vector.load %arg15[%110, %c0_45, %c0_46] : memref<2x1x32xf32, #tpu.memory_space<vmem>>, vector<1x1x32xf32>
    %112 = vector.shape_cast %111 : vector<1x1x32xf32> to vector<1x32xf32>
    %cst_47 = arith.constant dense<0.000000e+00> : vector<8xf32>
    %113 = vector.multi_reduction <add>, %106, %cst_47 [1] : vector<8x32xf32> to vector<8xf32>
    %114 = vector.shape_cast %113 : vector<8xf32> to vector<8x1xf32>
    %cst_48 = arith.constant 3.200000e+01 : f32
    %115 = vector.broadcast %cst_48 : f32 to vector<8x1xf32>
    %116 = arith.divf %114, %115 : vector<8x1xf32>
    %117 = vector.broadcast %116 : vector<8x1xf32> to vector<8x32xf32>
    %118 = arith.subf %106, %117 : vector<8x32xf32>
    %119 = arith.mulf %118, %118 : vector<8x32xf32>
    %cst_49 = arith.constant dense<0.000000e+00> : vector<8xf32>
    %120 = vector.multi_reduction <add>, %119, %cst_49 [1] : vector<8x32xf32> to vector<8xf32>
    %121 = vector.shape_cast %120 : vector<8xf32> to vector<8x1xf32>
    %cst_50 = arith.constant 3.200000e+01 : f32
    %122 = vector.broadcast %cst_50 : f32 to vector<8x1xf32>
    %123 = arith.divf %121, %122 : vector<8x1xf32>
    %124 = vector.broadcast %116 : vector<8x1xf32> to vector<8x32xf32>
    %125 = arith.subf %106, %124 : vector<8x32xf32>
    %cst_51 = arith.constant 9.99999974E-6 : f32
    %126 = vector.broadcast %cst_51 : f32 to vector<8x1xf32>
    %127 = arith.addf %123, %126 : vector<8x1xf32>
    %128 = math.rsqrt %127 : vector<8x1xf32>
    %129 = vector.broadcast %128 : vector<8x1xf32> to vector<8x32xf32>
    %130 = arith.mulf %125, %129 : vector<8x32xf32>
    %131 = vector.broadcast %109 : vector<1x32xf32> to vector<8x32xf32>
    %132 = arith.mulf %130, %131 : vector<8x32xf32>
    %133 = vector.broadcast %112 : vector<1x32xf32> to vector<8x32xf32>
    %134 = arith.addf %132, %133 : vector<8x32xf32>
    %135 = arith.truncf %134 : vector<8x32xf32> to vector<8x32xbf16>
    %136 = arith.index_cast %c0_i32 : i32 to index
    %c0_52 = arith.constant 0 : index
    %c0_53 = arith.constant 0 : index
    %137 = vector.load %arg16[%136, %c0_52, %c0_53] : memref<2x32x128xbf16, #tpu.memory_space<vmem>>, vector<1x32x128xbf16>
    %138 = vector.shape_cast %137 : vector<1x32x128xbf16> to vector<32x128xbf16>
    %cst_54 = arith.constant dense<0.000000e+00> : vector<8x128xf32>
    %139 = tpu.matmul %135, %138, %cst_54 {dimension_numbers = #tpu.dot_dimension_numbers<[1], [0], [0], [1], [0, 0, 1, 1], [], []>} : vector<8x32xbf16>, vector<32x128xbf16>, vector<8x128xf32> -> vector<8x128xf32>
    %140 = arith.index_cast %c0_i32 : i32 to index
    %c0_55 = arith.constant 0 : index
    %c0_56 = arith.constant 0 : index
    %141 = vector.load %arg17[%140, %c0_55, %c0_56] : memref<2x1x128xf32, #tpu.memory_space<vmem>>, vector<1x1x128xf32>
    %142 = vector.shape_cast %141 : vector<1x1x128xf32> to vector<1x128xf32>
    %143 = vector.broadcast %142 : vector<1x128xf32> to vector<8x128xf32>
    %144 = arith.addf %139, %143 : vector<8x128xf32>
    %cst_57 = arith.constant 1.702000e+00 : f32
    %145 = vector.broadcast %cst_57 : f32 to vector<8x128xf32>
    %146 = arith.mulf %145, %144 : vector<8x128xf32>
    %147 = arith.negf %146 : vector<8x128xf32>
    %148 = math.exp %147 : vector<8x128xf32>
    %cst_58 = arith.constant 1.000000e+00 : f32
    %149 = vector.broadcast %cst_58 : f32 to vector<8x128xf32>
    %150 = arith.addf %149, %148 : vector<8x128xf32>
    %151 = arith.divf %149, %150 : vector<8x128xf32>
    %152 = arith.mulf %144, %151 : vector<8x128xf32>
    %153 = arith.truncf %152 : vector<8x128xf32> to vector<8x128xbf16>
    %154 = arith.index_cast %c0_i32 : i32 to index
    %c0_59 = arith.constant 0 : index
    %c0_60 = arith.constant 0 : index
    %155 = vector.load %arg18[%154, %c0_59, %c0_60] : memref<2x128x32xbf16, #tpu.memory_space<vmem>>, vector<1x128x32xbf16>
    %156 = vector.shape_cast %155 : vector<1x128x32xbf16> to vector<128x32xbf16>
    %cst_61 = arith.constant dense<0.000000e+00> : vector<8x32xf32>
    %157 = tpu.matmul %153, %156, %cst_61 {dimension_numbers = #tpu.dot_dimension_numbers<[1], [0], [0], [1], [0, 0, 1, 1], [], []>} : vector<8x128xbf16>, vector<128x32xbf16>, vector<8x32xf32> -> vector<8x32xf32>
    %158 = arith.addf %106, %157 : vector<8x32xf32>
    %159 = arith.index_cast %c0_i32 : i32 to index
    %c0_62 = arith.constant 0 : index
    %c0_63 = arith.constant 0 : index
    %160 = vector.load %arg19[%159, %c0_62, %c0_63] : memref<2x1x32xf32, #tpu.memory_space<vmem>>, vector<1x1x32xf32>
    %161 = vector.shape_cast %160 : vector<1x1x32xf32> to vector<1x32xf32>
    %162 = vector.broadcast %161 : vector<1x32xf32> to vector<8x32xf32>
    %163 = arith.addf %158, %162 : vector<8x32xf32>
    %c1_i32 = arith.constant 1 : i32
    %164 = arith.index_cast %c1_i32 : i32 to index
    %c0_64 = arith.constant 0 : index
    %c0_65 = arith.constant 0 : index
    %165 = vector.load %arg4[%164, %c0_64, %c0_65] : memref<2x1x32xf32, #tpu.memory_space<vmem>>, vector<1x1x32xf32>
    %166 = vector.shape_cast %165 : vector<1x1x32xf32> to vector<1x32xf32>
    %167 = arith.index_cast %c1_i32 : i32 to index
    %c0_66 = arith.constant 0 : index
    %c0_67 = arith.constant 0 : index
    %168 = vector.load %arg5[%167, %c0_66, %c0_67] : memref<2x1x32xf32, #tpu.memory_space<vmem>>, vector<1x1x32xf32>
    %169 = vector.shape_cast %168 : vector<1x1x32xf32> to vector<1x32xf32>
    %cst_68 = arith.constant dense<0.000000e+00> : vector<8xf32>
    %170 = vector.multi_reduction <add>, %163, %cst_68 [1] : vector<8x32xf32> to vector<8xf32>
    %171 = vector.shape_cast %170 : vector<8xf32> to vector<8x1xf32>
    %cst_69 = arith.constant 3.200000e+01 : f32
    %172 = vector.broadcast %cst_69 : f32 to vector<8x1xf32>
    %173 = arith.divf %171, %172 : vector<8x1xf32>
    %174 = vector.broadcast %173 : vector<8x1xf32> to vector<8x32xf32>
    %175 = arith.subf %163, %174 : vector<8x32xf32>
    %176 = arith.mulf %175, %175 : vector<8x32xf32>
    %cst_70 = arith.constant dense<0.000000e+00> : vector<8xf32>
    %177 = vector.multi_reduction <add>, %176, %cst_70 [1] : vector<8x32xf32> to vector<8xf32>
    %178 = vector.shape_cast %177 : vector<8xf32> to vector<8x1xf32>
    %cst_71 = arith.constant 3.200000e+01 : f32
    %179 = vector.broadcast %cst_71 : f32 to vector<8x1xf32>
    %180 = arith.divf %178, %179 : vector<8x1xf32>
    %181 = vector.broadcast %173 : vector<8x1xf32> to vector<8x32xf32>
    %182 = arith.subf %163, %181 : vector<8x32xf32>
    %cst_72 = arith.constant 9.99999974E-6 : f32
    %183 = vector.broadcast %cst_72 : f32 to vector<8x1xf32>
    %184 = arith.addf %180, %183 : vector<8x1xf32>
    %185 = math.rsqrt %184 : vector<8x1xf32>
    %186 = vector.broadcast %185 : vector<8x1xf32> to vector<8x32xf32>
    %187 = arith.mulf %182, %186 : vector<8x32xf32>
    %188 = vector.broadcast %166 : vector<1x32xf32> to vector<8x32xf32>
    %189 = arith.mulf %187, %188 : vector<8x32xf32>
    %190 = vector.broadcast %169 : vector<1x32xf32> to vector<8x32xf32>
    %191 = arith.addf %189, %190 : vector<8x32xf32>
    %192 = arith.truncf %191 : vector<8x32xf32> to vector<8x32xbf16>
    %193 = arith.index_cast %c1_i32 : i32 to index
    %c0_73 = arith.constant 0 : index
    %c0_74 = arith.constant 0 : index
    %194 = vector.load %arg6[%193, %c0_73, %c0_74] : memref<2x32x32xbf16, #tpu.memory_space<vmem>>, vector<1x32x32xbf16>
    %195 = vector.shape_cast %194 : vector<1x32x32xbf16> to vector<32x32xbf16>
    %cst_75 = arith.constant dense<0.000000e+00> : vector<8x32xf32>
    %196 = tpu.matmul %192, %195, %cst_75 {dimension_numbers = #tpu.dot_dimension_numbers<[1], [0], [0], [1], [0, 0, 1, 1], [], []>} : vector<8x32xbf16>, vector<32x32xbf16>, vector<8x32xf32> -> vector<8x32xf32>
    %197 = arith.index_cast %c1_i32 : i32 to index
    %c0_76 = arith.constant 0 : index
    %c0_77 = arith.constant 0 : index
    %198 = vector.load %arg7[%197, %c0_76, %c0_77] : memref<2x1x32xf32, #tpu.memory_space<vmem>>, vector<1x1x32xf32>
    %199 = vector.shape_cast %198 : vector<1x1x32xf32> to vector<1x32xf32>
    %200 = vector.broadcast %199 : vector<1x32xf32> to vector<8x32xf32>
    %201 = arith.addf %196, %200 : vector<8x32xf32>
    %202 = arith.index_cast %c1_i32 : i32 to index
    %c0_78 = arith.constant 0 : index
    %c0_79 = arith.constant 0 : index
    %203 = vector.load %arg8[%202, %c0_78, %c0_79] : memref<2x32x32xbf16, #tpu.memory_space<vmem>>, vector<1x32x32xbf16>
    %204 = vector.shape_cast %203 : vector<1x32x32xbf16> to vector<32x32xbf16>
    %cst_80 = arith.constant dense<0.000000e+00> : vector<8x32xf32>
    %205 = tpu.matmul %192, %204, %cst_80 {dimension_numbers = #tpu.dot_dimension_numbers<[1], [0], [0], [1], [0, 0, 1, 1], [], []>} : vector<8x32xbf16>, vector<32x32xbf16>, vector<8x32xf32> -> vector<8x32xf32>
    %206 = arith.index_cast %c1_i32 : i32 to index
    %c0_81 = arith.constant 0 : index
    %c0_82 = arith.constant 0 : index
    %207 = vector.load %arg9[%206, %c0_81, %c0_82] : memref<2x1x32xf32, #tpu.memory_space<vmem>>, vector<1x1x32xf32>
    %208 = vector.shape_cast %207 : vector<1x1x32xf32> to vector<1x32xf32>
    %209 = vector.broadcast %208 : vector<1x32xf32> to vector<8x32xf32>
    %210 = arith.addf %205, %209 : vector<8x32xf32>
    %211 = arith.index_cast %c1_i32 : i32 to index
    %c0_83 = arith.constant 0 : index
    %c0_84 = arith.constant 0 : index
    %212 = vector.load %arg10[%211, %c0_83, %c0_84] : memref<2x32x32xbf16, #tpu.memory_space<vmem>>, vector<1x32x32xbf16>
    %213 = vector.shape_cast %212 : vector<1x32x32xbf16> to vector<32x32xbf16>
    %cst_85 = arith.constant dense<0.000000e+00> : vector<8x32xf32>
    %214 = tpu.matmul %192, %213, %cst_85 {dimension_numbers = #tpu.dot_dimension_numbers<[1], [0], [0], [1], [0, 0, 1, 1], [], []>} : vector<8x32xbf16>, vector<32x32xbf16>, vector<8x32xf32> -> vector<8x32xf32>
    %215 = arith.index_cast %c1_i32 : i32 to index
    %c0_86 = arith.constant 0 : index
    %c0_87 = arith.constant 0 : index
    %216 = vector.load %arg11[%215, %c0_86, %c0_87] : memref<2x1x32xf32, #tpu.memory_space<vmem>>, vector<1x1x32xf32>
    %217 = vector.shape_cast %216 : vector<1x1x32xf32> to vector<1x32xf32>
    %218 = vector.broadcast %217 : vector<1x32xf32> to vector<8x32xf32>
    %219 = arith.addf %214, %218 : vector<8x32xf32>
    %220 = vector.shape_cast %201 : vector<8x32xf32> to vector<8x4x8xf32>
    %221 = vector.shape_cast %210 : vector<8x32xf32> to vector<8x4x8xf32>
    %222 = vector.shape_cast %219 : vector<8x32xf32> to vector<8x4x8xf32>
    "tpu.trace_start"() <{level = 10 : i32, message = "qhd,khd->hqk"}> : () -> ()
    %cst_88 = arith.constant dense<0.000000e+00> : vector<4x8x8xf32>
    %223 = tpu.matmul %220, %221, %cst_88 {dimension_numbers = #tpu.dot_dimension_numbers<[2], [2], [0], [0], [0, 1, 0, 0, 1, 0], [1], [1]>} : vector<8x4x8xf32>, vector<8x4x8xf32>, vector<4x8x8xf32> -> vector<4x8x8xf32>
    "tpu.trace_stop"() : () -> ()
    %cst_89 = arith.constant 0.353553385 : f32
    %224 = vector.broadcast %cst_89 : f32 to vector<4x8x8xf32>
    %225 = arith.mulf %223, %224 : vector<4x8x8xf32>
    %226 = vector.broadcast %17 : vector<1x8x8xf32> to vector<4x8x8xf32>
    %227 = arith.addf %225, %226 : vector<4x8x8xf32>
    %cst_90 = arith.constant dense<0xFF800000> : vector<4x8xf32>
    %228 = vector.multi_reduction <maximumf>, %227, %cst_90 [2] : vector<4x8x8xf32> to vector<4x8xf32>
    %cst_91 = arith.constant 0xFF800000 : f32
    %229 = vector.broadcast %cst_91 : f32 to vector<4x8xf32>
    %230 = arith.maximumf %229, %228 : vector<4x8xf32>
    %231 = vector.shape_cast %230 : vector<4x8xf32> to vector<4x8x1xf32>
    %232 = vector.broadcast %231 : vector<4x8x1xf32> to vector<4x8x8xf32>
    %233 = arith.subf %227, %232 : vector<4x8x8xf32>
    %234 = math.exp %233 : vector<4x8x8xf32>
    %cst_92 = arith.constant dense<0.000000e+00> : vector<4x8xf32>
    %235 = vector.multi_reduction <add>, %234, %cst_92 [2] : vector<4x8x8xf32> to vector<4x8xf32>
    %236 = vector.shape_cast %235 : vector<4x8xf32> to vector<4x8x1xf32>
    %237 = vector.broadcast %236 : vector<4x8x1xf32> to vector<4x8x8xf32>
    %238 = arith.divf %234, %237 : vector<4x8x8xf32>
    "tpu.trace_start"() <{level = 10 : i32, message = "hqk,khd->qhd"}> : () -> ()
    %cst_93 = arith.constant dense<0.000000e+00> : vector<4x8x8xf32>
    %239 = tpu.matmul %222, %238, %cst_93 {dimension_numbers = #tpu.dot_dimension_numbers<[0], [2], [2], [1], [0, 1, 0, 2, 1, 1], [1], [0]>} : vector<8x4x8xf32>, vector<4x8x8xf32>, vector<4x8x8xf32> -> vector<4x8x8xf32>
    %240 = tpu.transpose %239, [2, 0, 1] : vector<4x8x8xf32> -> vector<8x4x8xf32>
    "tpu.trace_stop"() : () -> ()
    %241 = vector.shape_cast %240 : vector<8x4x8xf32> to vector<8x32xf32>
    %242 = arith.truncf %241 : vector<8x32xf32> to vector<8x32xbf16>
    %243 = arith.index_cast %c1_i32 : i32 to index
    %c0_94 = arith.constant 0 : index
    %c0_95 = arith.constant 0 : index
    %244 = vector.load %arg12[%243, %c0_94, %c0_95] : memref<2x32x32xbf16, #tpu.memory_space<vmem>>, vector<1x32x32xbf16>
    %245 = vector.shape_cast %244 : vector<1x32x32xbf16> to vector<32x32xbf16>
    %cst_96 = arith.constant dense<0.000000e+00> : vector<8x32xf32>
    %246 = tpu.matmul %242, %245, %cst_96 {dimension_numbers = #tpu.dot_dimension_numbers<[1], [0], [0], [1], [0, 0, 1, 1], [], []>} : vector<8x32xbf16>, vector<32x32xbf16>, vector<8x32xf32> -> vector<8x32xf32>
    %247 = arith.addf %163, %246 : vector<8x32xf32>
    %248 = arith.index_cast %c1_i32 : i32 to index
    %c0_97 = arith.constant 0 : index
    %c0_98 = arith.constant 0 : index
    %249 = vector.load %arg13[%248, %c0_97, %c0_98] : memref<2x1x32xf32, #tpu.memory_space<vmem>>, vector<1x1x32xf32>
    %250 = vector.shape_cast %249 : vector<1x1x32xf32> to vector<1x32xf32>
    %251 = vector.broadcast %250 : vector<1x32xf32> to vector<8x32xf32>
    %252 = arith.addf %247, %251 : vector<8x32xf32>
    %253 = arith.index_cast %c1_i32 : i32 to index
    %c0_99 = arith.constant 0 : index
    %c0_100 = arith.constant 0 : index
    %254 = vector.load %arg14[%253, %c0_99, %c0_100] : memref<2x1x32xf32, #tpu.memory_space<vmem>>, vector<1x1x32xf32>
    %255 = vector.shape_cast %254 : vector<1x1x32xf32> to vector<1x32xf32>
    %256 = arith.index_cast %c1_i32 : i32 to index
    %c0_101 = arith.constant 0 : index
    %c0_102 = arith.constant 0 : index
    %257 = vector.load %arg15[%256, %c0_101, %c0_102] : memref<2x1x32xf32, #tpu.memory_space<vmem>>, vector<1x1x32xf32>
    %258 = vector.shape_cast %257 : vector<1x1x32xf32> to vector<1x32xf32>
    %cst_103 = arith.constant dense<0.000000e+00> : vector<8xf32>
    %259 = vector.multi_reduction <add>, %252, %cst_103 [1] : vector<8x32xf32> to vector<8xf32>
    %260 = vector.shape_cast %259 : vector<8xf32> to vector<8x1xf32>
    %cst_104 = arith.constant 3.200000e+01 : f32
    %261 = vector.broadcast %cst_104 : f32 to vector<8x1xf32>
    %262 = arith.divf %260, %261 : vector<8x1xf32>
    %263 = vector.broadcast %262 : vector<8x1xf32> to vector<8x32xf32>
    %264 = arith.subf %252, %263 : vector<8x32xf32>
    %265 = arith.mulf %264, %264 : vector<8x32xf32>
    %cst_105 = arith.constant dense<0.000000e+00> : vector<8xf32>
    %266 = vector.multi_reduction <add>, %265, %cst_105 [1] : vector<8x32xf32> to vector<8xf32>
    %267 = vector.shape_cast %266 : vector<8xf32> to vector<8x1xf32>
    %cst_106 = arith.constant 3.200000e+01 : f32
    %268 = vector.broadcast %cst_106 : f32 to vector<8x1xf32>
    %269 = arith.divf %267, %268 : vector<8x1xf32>
    %270 = vector.broadcast %262 : vector<8x1xf32> to vector<8x32xf32>
    %271 = arith.subf %252, %270 : vector<8x32xf32>
    %cst_107 = arith.constant 9.99999974E-6 : f32
    %272 = vector.broadcast %cst_107 : f32 to vector<8x1xf32>
    %273 = arith.addf %269, %272 : vector<8x1xf32>
    %274 = math.rsqrt %273 : vector<8x1xf32>
    %275 = vector.broadcast %274 : vector<8x1xf32> to vector<8x32xf32>
    %276 = arith.mulf %271, %275 : vector<8x32xf32>
    %277 = vector.broadcast %255 : vector<1x32xf32> to vector<8x32xf32>
    %278 = arith.mulf %276, %277 : vector<8x32xf32>
    %279 = vector.broadcast %258 : vector<1x32xf32> to vector<8x32xf32>
    %280 = arith.addf %278, %279 : vector<8x32xf32>
    %281 = arith.truncf %280 : vector<8x32xf32> to vector<8x32xbf16>
    %282 = arith.index_cast %c1_i32 : i32 to index
    %c0_108 = arith.constant 0 : index
    %c0_109 = arith.constant 0 : index
    %283 = vector.load %arg16[%282, %c0_108, %c0_109] : memref<2x32x128xbf16, #tpu.memory_space<vmem>>, vector<1x32x128xbf16>
    %284 = vector.shape_cast %283 : vector<1x32x128xbf16> to vector<32x128xbf16>
    %cst_110 = arith.constant dense<0.000000e+00> : vector<8x128xf32>
    %285 = tpu.matmul %281, %284, %cst_110 {dimension_numbers = #tpu.dot_dimension_numbers<[1], [0], [0], [1], [0, 0, 1, 1], [], []>} : vector<8x32xbf16>, vector<32x128xbf16>, vector<8x128xf32> -> vector<8x128xf32>
    %286 = arith.index_cast %c1_i32 : i32 to index
    %c0_111 = arith.constant 0 : index
    %c0_112 = arith.constant 0 : index
    %287 = vector.load %arg17[%286, %c0_111, %c0_112] : memref<2x1x128xf32, #tpu.memory_space<vmem>>, vector<1x1x128xf32>
    %288 = vector.shape_cast %287 : vector<1x1x128xf32> to vector<1x128xf32>
    %289 = vector.broadcast %288 : vector<1x128xf32> to vector<8x128xf32>
    %290 = arith.addf %285, %289 : vector<8x128xf32>
    %cst_113 = arith.constant 1.702000e+00 : f32
    %291 = vector.broadcast %cst_113 : f32 to vector<8x128xf32>
    %292 = arith.mulf %291, %290 : vector<8x128xf32>
    %293 = arith.negf %292 : vector<8x128xf32>
    %294 = math.exp %293 : vector<8x128xf32>
    %cst_114 = arith.constant 1.000000e+00 : f32
    %295 = vector.broadcast %cst_114 : f32 to vector<8x128xf32>
    %296 = arith.addf %295, %294 : vector<8x128xf32>
    %297 = arith.divf %295, %296 : vector<8x128xf32>
    %298 = arith.mulf %290, %297 : vector<8x128xf32>
    %299 = arith.truncf %298 : vector<8x128xf32> to vector<8x128xbf16>
    %300 = arith.index_cast %c1_i32 : i32 to index
    %c0_115 = arith.constant 0 : index
    %c0_116 = arith.constant 0 : index
    %301 = vector.load %arg18[%300, %c0_115, %c0_116] : memref<2x128x32xbf16, #tpu.memory_space<vmem>>, vector<1x128x32xbf16>
    %302 = vector.shape_cast %301 : vector<1x128x32xbf16> to vector<128x32xbf16>
    %cst_117 = arith.constant dense<0.000000e+00> : vector<8x32xf32>
    %303 = tpu.matmul %299, %302, %cst_117 {dimension_numbers = #tpu.dot_dimension_numbers<[1], [0], [0], [1], [0, 0, 1, 1], [], []>} : vector<8x128xbf16>, vector<128x32xbf16>, vector<8x32xf32> -> vector<8x32xf32>
    %304 = arith.addf %252, %303 : vector<8x32xf32>
    %305 = arith.index_cast %c1_i32 : i32 to index
    %c0_118 = arith.constant 0 : index
    %c0_119 = arith.constant 0 : index
    %306 = vector.load %arg19[%305, %c0_118, %c0_119] : memref<2x1x32xf32, #tpu.memory_space<vmem>>, vector<1x1x32xf32>
    %307 = vector.shape_cast %306 : vector<1x1x32xf32> to vector<1x32xf32>
    %308 = vector.broadcast %307 : vector<1x32xf32> to vector<8x32xf32>
    %309 = arith.addf %304, %308 : vector<8x32xf32>
    %c2_i32 = arith.constant 2 : i32
    %310 = tpu.iota {dimensions = array<i32: 0>} : vector<8x1xi32>
    %cst_120 = arith.constant dense<-2147483648> : vector<1xi32>
    %311 = vector.multi_reduction <maxsi>, %1, %cst_120 [0] : vector<8x1xi32> to vector<1xi32>
    %312 = vector.shape_cast %311 : vector<1xi32> to vector<1x1xi32>
    %313 = vector.broadcast %312 : vector<1x1xi32> to vector<8x1xi32>
    %314 = arith.cmpi eq, %1, %313 : vector<8x1xi32>
    %c8_i32 = arith.constant 8 : i32
    %315 = vector.broadcast %c8_i32 : i32 to vector<8x1xi32>
    %316 = arith.select %314, %310, %315 : vector<8x1xi1>, vector<8x1xi32>
    %cst_121 = arith.constant dense<2147483647> : vector<1xi32>
    %317 = vector.multi_reduction <minsi>, %316, %cst_121 [0] : vector<8x1xi32> to vector<1xi32>
    %318 = vector.shape_cast %317 : vector<1xi32> to vector<1x1xi32>
    %319 = vector.broadcast %318 : vector<1x1xi32> to vector<8x1xi32>
    %320 = arith.cmpi eq, %310, %319 : vector<8x1xi32>
    %321 = arith.extui %320 : vector<8x1xi1> to vector<8x1xi32>
    %322 = arith.sitofp %321 : vector<8x1xi32> to vector<8x1xf32>
    %323 = vector.broadcast %322 : vector<8x1xf32> to vector<8x32xf32>
    %324 = arith.mulf %309, %323 : vector<8x32xf32>
    %cst_122 = arith.constant dense<0.000000e+00> : vector<32xf32>
    %325 = vector.multi_reduction <add>, %324, %cst_122 [0] : vector<8x32xf32> to vector<32xf32>
    %326 = vector.shape_cast %325 : vector<32xf32> to vector<1x32xf32>
    %c0_123 = arith.constant 0 : index
    %c0_124 = arith.constant 0 : index
    %327 = vector.load %arg20[%c0_123, %c0_124] : memref<1x32xf32, #tpu.memory_space<vmem>>, vector<1x32xf32>
    %c0_125 = arith.constant 0 : index
    %c0_126 = arith.constant 0 : index
    %328 = vector.load %arg21[%c0_125, %c0_126] : memref<1x32xf32, #tpu.memory_space<vmem>>, vector<1x32xf32>
    %cst_127 = arith.constant dense<0.000000e+00> : vector<1xf32>
    %329 = vector.multi_reduction <add>, %326, %cst_127 [1] : vector<1x32xf32> to vector<1xf32>
    %330 = vector.shape_cast %329 : vector<1xf32> to vector<1x1xf32>
    %cst_128 = arith.constant 3.200000e+01 : f32
    %331 = vector.broadcast %cst_128 : f32 to vector<1x1xf32>
    %332 = arith.divf %330, %331 : vector<1x1xf32>
    %333 = vector.broadcast %332 : vector<1x1xf32> to vector<1x32xf32>
    %334 = arith.subf %326, %333 : vector<1x32xf32>
    %335 = arith.mulf %334, %334 : vector<1x32xf32>
    %cst_129 = arith.constant dense<0.000000e+00> : vector<1xf32>
    %336 = vector.multi_reduction <add>, %335, %cst_129 [1] : vector<1x32xf32> to vector<1xf32>
    %337 = vector.shape_cast %336 : vector<1xf32> to vector<1x1xf32>
    %cst_130 = arith.constant 3.200000e+01 : f32
    %338 = vector.broadcast %cst_130 : f32 to vector<1x1xf32>
    %339 = arith.divf %337, %338 : vector<1x1xf32>
    %340 = vector.broadcast %332 : vector<1x1xf32> to vector<1x32xf32>
    %341 = arith.subf %326, %340 : vector<1x32xf32>
    %cst_131 = arith.constant 9.99999974E-6 : f32
    %342 = vector.broadcast %cst_131 : f32 to vector<1x1xf32>
    %343 = arith.addf %339, %342 : vector<1x1xf32>
    %344 = math.rsqrt %343 : vector<1x1xf32>
    %345 = vector.broadcast %344 : vector<1x1xf32> to vector<1x32xf32>
    %346 = arith.mulf %341, %345 : vector<1x32xf32>
    %347 = arith.mulf %346, %327 : vector<1x32xf32>
    %348 = arith.addf %347, %328 : vector<1x32xf32>
    %349 = arith.truncf %348 : vector<1x32xf32> to vector<1x32xbf16>
    %c0_132 = arith.constant 0 : index
    %c0_133 = arith.constant 0 : index
    %350 = vector.load %arg22[%c0_132, %c0_133] : memref<32x128xbf16, #tpu.memory_space<vmem>>, vector<32x128xbf16>
    %cst_134 = arith.constant dense<0.000000e+00> : vector<1x128xf32>
    %351 = tpu.matmul %349, %350, %cst_134 {dimension_numbers = #tpu.dot_dimension_numbers<[1], [0], [0], [1], [0, 0, 1, 1], [], []>} : vector<1x32xbf16>, vector<32x128xbf16>, vector<1x128xf32> -> vector<1x128xf32>
    %c0_135 = arith.constant 0 : index
    %c0_136 = arith.constant 0 : index
    %c0_137 = arith.constant 0 : index
    %352 = vector.load %arg23[%c0_135, %c0_136, %c0_137] : memref<1x1x128xf32, #tpu.memory_space<vmem>>, vector<1x1x128xf32>
    %353 = vector.shape_cast %352 : vector<1x1x128xf32> to vector<1x128xf32>
    %354 = vector.shape_cast %351 : vector<1x128xf32> to vector<1x1x128xf32>
    tpu.vector_store %arg23[%c0_135, %c0_136, %c0_137], %354 {strides = array<i32>} : memref<1x1x128xf32, #tpu.memory_space<vmem>>, vector<1x1x128xf32>,
    return
  }
  func.func @transform_0(%arg0: i32) -> (i32, i32, i32) {
    %c0_i32 = arith.constant 0 : i32
    %c0_i32_0 = arith.constant 0 : i32
    %c0_i32_1 = arith.constant 0 : i32
    return %arg0, %c0_i32, %c0_i32_0 : i32, i32, i32
  }
  func.func @transform_1(%arg0: i32) -> (i32, i32) {
    %c0_i32 = arith.constant 0 : i32
    %c0_i32_0 = arith.constant 0 : i32
    %c0_i32_1 = arith.constant 0 : i32
    return %c0_i32, %c0_i32_0 : i32, i32
  }
  func.func @transform_2(%arg0: i32) -> (i32, i32) {
    %c0_i32 = arith.constant 0 : i32
    %c0_i32_0 = arith.constant 0 : i32
    %c0_i32_1 = arith.constant 0 : i32
    return %c0_i32, %c0_i32_0 : i32, i32
  }
  func.func @transform_3(%arg0: i32) -> (i32, i32, i32) {
    %c0_i32 = arith.constant 0 : i32
    %c0_i32_0 = arith.constant 0 : i32
    %c0_i32_1 = arith.constant 0 : i32
    %c0_i32_2 = arith.constant 0 : i32
    return %c0_i32, %c0_i32_0, %c0_i32_1 : i32, i32, i32
  }
  func.func @transform_4(%arg0: i32) -> (i32, i32, i32) {
    %c0_i32 = arith.constant 0 : i32
    %c0_i32_0 = arith.constant 0 : i32
    %c0_i32_1 = arith.constant 0 : i32
    %c0_i32_2 = arith.constant 0 : i32
    return %c0_i32, %c0_i32_0, %c0_i32_1 : i32, i32, i32
  }
  func.func @transform_5(%arg0: i32) -> (i32, i32, i32) {
    %c0_i32 = arith.constant 0 : i32
    %c0_i32_0 = arith.constant 0 : i32
    %c0_i32_1 = arith.constant 0 : i32
    %c0_i32_2 = arith.constant 0 : i32
    return %c0_i32, %c0_i32_0, %c0_i32_1 : i32, i32, i32
  }
  func.func @transform_6(%arg0: i32) -> (i32, i32, i32) {
    %c0_i32 = arith.constant 0 : i32
    %c0_i32_0 = arith.constant 0 : i32
    %c0_i32_1 = arith.constant 0 : i32
    %c0_i32_2 = arith.constant 0 : i32
    return %c0_i32, %c0_i32_0, %c0_i32_1 : i32, i32, i32
  }
  func.func @transform_7(%arg0: i32) -> (i32, i32, i32) {
    %c0_i32 = arith.constant 0 : i32
    %c0_i32_0 = arith.constant 0 : i32
    %c0_i32_1 = arith.constant 0 : i32
    %c0_i32_2 = arith.constant 0 : i32
    return %c0_i32, %c0_i32_0, %c0_i32_1 : i32, i32, i32
  }
  func.func @transform_8(%arg0: i32) -> (i32, i32, i32) {
    %c0_i32 = arith.constant 0 : i32
    %c0_i32_0 = arith.constant 0 : i32
    %c0_i32_1 = arith.constant 0 : i32
    %c0_i32_2 = arith.constant 0 : i32
    return %c0_i32, %c0_i32_0, %c0_i32_1 : i32, i32, i32
  }
  func.func @transform_9(%arg0: i32) -> (i32, i32, i32) {
    %c0_i32 = arith.constant 0 : i32
    %c0_i32_0 = arith.constant 0 : i32
    %c0_i32_1 = arith.constant 0 : i32
    %c0_i32_2 = arith.constant 0 : i32
    return %c0_i32, %c0_i32_0, %c0_i32_1 : i32, i32, i32
  }
  func.func @transform_10(%arg0: i32) -> (i32, i32, i32) {
    %c0_i32 = arith.constant 0 : i32
    %c0_i32_0 = arith.constant 0 : i32
    %c0_i32_1 = arith.constant 0 : i32
    %c0_i32_2 = arith.constant 0 : i32
    return %c0_i32, %c0_i32_0, %c0_i32_1 : i32, i32, i32
  }
  func.func @transform_11(%arg0: i32) -> (i32, i32, i32) {
    %c0_i32 = arith.constant 0 : i32
    %c0_i32_0 = arith.constant 0 : i32
    %c0_i32_1 = arith.constant 0 : i32
    %c0_i32_2 = arith.constant 0 : i32
    return %c0_i32, %c0_i32_0, %c0_i32_1 : i32, i32, i32
  }
  func.func @transform_12(%arg0: i32) -> (i32, i32, i32) {
    %c0_i32 = arith.constant 0 : i32
    %c0_i32_0 = arith.constant 0 : i32
    %c0_i32_1 = arith.constant 0 : i32
    %c0_i32_2 = arith.constant 0 : i32
    return %c0_i32, %c0_i32_0, %c0_i32_1 : i32, i32, i32
  }
  func.func @transform_13(%arg0: i32) -> (i32, i32, i32) {
    %c0_i32 = arith.constant 0 : i32
    %c0_i32_0 = arith.constant 0 : i32
    %c0_i32_1 = arith.constant 0 : i32
    %c0_i32_2 = arith.constant 0 : i32
    return %c0_i32, %c0_i32_0, %c0_i32_1 : i32, i32, i32
  }
  func.func @transform_14(%arg0: i32) -> (i32, i32, i32) {
    %c0_i32 = arith.constant 0 : i32
    %c0_i32_0 = arith.constant 0 : i32
    %c0_i32_1 = arith.constant 0 : i32
    %c0_i32_2 = arith.constant 0 : i32
    return %c0_i32, %c0_i32_0, %c0_i32_1 : i32, i32, i32
  }
  func.func @transform_15(%arg0: i32) -> (i32, i32, i32) {
    %c0_i32 = arith.constant 0 : i32
    %c0_i32_0 = arith.constant 0 : i32
    %c0_i32_1 = arith.constant 0 : i32
    %c0_i32_2 = arith.constant 0 : i32
    return %c0_i32, %c0_i32_0, %c0_i32_1 : i32, i32, i32
  }
  func.func @transform_16(%arg0: i32) -> (i32, i32, i32) {
    %c0_i32 = arith.constant 0 : i32
    %c0_i32_0 = arith.constant 0 : i32
    %c0_i32_1 = arith.constant 0 : i32
    %c0_i32_2 = arith.constant 0 : i32
    return %c0_i32, %c0_i32_0, %c0_i32_1 : i32, i32, i32
  }
  func.func @transform_17(%arg0: i32) -> (i32, i32, i32) {
    %c0_i32 = arith.constant 0 : i32
    %c0_i32_0 = arith.constant 0 : i32
    %c0_i32_1 = arith.constant 0 : i32
    %c0_i32_2 = arith.constant 0 : i32
    return %c0_i32, %c0_i32_0, %c0_i32_1 : i32, i32, i32
  }
  func.func @transform_18(%arg0: i32) -> (i32, i32, i32) {
    %c0_i32 = arith.constant 0 : i32
    %c0_i32_0 = arith.constant 0 : i32
    %c0_i32_1 = arith.constant 0 : i32
    %c0_i32_2 = arith.constant 0 : i32
    return %c0_i32, %c0_i32_0, %c0_i32_1 : i32, i32, i32
  }
  func.func @transform_19(%arg0: i32) -> (i32, i32) {
    %c0_i32 = arith.constant 0 : i32
    %c0_i32_0 = arith.constant 0 : i32
    %c0_i32_1 = arith.constant 0 : i32
    return %c0_i32, %c0_i32_0 : i32, i32
  }
  func.func @transform_20(%arg0: i32) -> (i32, i32) {
    %c0_i32 = arith.constant 0 : i32
    %c0_i32_0 = arith.constant 0 : i32
    %c0_i32_1 = arith.constant 0 : i32
    return %c0_i32, %c0_i32_0 : i32, i32
  }
  func.func @transform_21(%arg0: i32) -> (i32, i32) {
    %c0_i32 = arith.constant 0 : i32
    %c0_i32_0 = arith.constant 0 : i32
    %c0_i32_1 = arith.constant 0 : i32
    return %c0_i32, %c0_i32_0 : i32, i32
  }
  func.func @transform_22(%arg0: i32) -> (i32, i32, i32) {
    %c0_i32 = arith.constant 0 : i32
    %c0_i32_0 = arith.constant 0 : i32
    %c0_i32_1 = arith.constant 0 : i32
    return %arg0, %c0_i32, %c0_i32_0 : i32, i32, i32
  }
}

</mosaic_0001>

<bundles_post_ra>
// kernel: tpu_custom_call.1
= control target key start
LH: loop header
LB: loop body
LE: loop exit
PB: predicated region body
PF: predicated region fallthrough
CT: control target
= control target key end

     0   :  { %s4478_s0 = inlined_call_operand.vmem [shape: s32[2,8,1], index: 0, kind: input, shape index: {}]   ;;  %s4479_s1 = inlined_call_operand.vmem [shape: f32[64,32], index: 1, kind: input, shape index: {}]   ;;  %s4480_s2 = inlined_call_operand.vmem [shape: f32[8,32], index: 2, kind: input, shape index: {}]   ;;  %s4481_s3 = inlined_call_operand.vmem [shape: f32[2,1,32], index: 3, kind: input, shape index: {}]   ;;  %s4482_s4 = inlined_call_operand.vmem [shape: f32[2,1,32], index: 4, kind: input, shape index: {}]   ;;  %s4483_s5 = inlined_call_operand.vmem [shape: bf16[2,32,32], index: 5, kind: input, shape index: {}]   ;;  %s4484_s6 = inlined_call_operand.vmem [shape: f32[2,1,32], index: 6, kind: input, shape index: {}]   ;;  %s4485_s7 = inlined_call_operand.vmem [shape: bf16[2,32,32], index: 7, kind: input, shape index: {}]   ;;  %s4486_s8 = inlined_call_operand.vmem [shape: f32[2,1,32], index: 8, kind: input, shape index: {}]   ;;  %s4487_s9 = inlined_call_operand.vmem [shape: bf16[2,32,32], index: 9, kind: input, shape index: {}]   ;;  %s4488_s10 = inlined_call_operand.vmem [shape: f32[2,1,32], index: 10, kind: input, shape index: {}]   ;;  %s4489_s11 = inlined_call_operand.vmem [shape: bf16[2,32,32], index: 11, kind: input, shape index: {}]   ;;  %s4490_s12 = inlined_call_operand.vmem [shape: f32[2,1,32], index: 12, kind: input, shape index: {}]   ;;  %s4491_s13 = inlined_call_operand.vmem [shape: f32[2,1,32], index: 13, kind: input, shape index: {}]   ;;  %s4492_s14 = inlined_call_operand.vmem [shape: f32[2,1,32], index: 14, kind: input, shape index: {}]   ;;  %s4493_s15 = inlined_call_operand.vmem [shape: bf16[2,32,128], index: 15, kind: input, shape index: {}]   ;;  %s4494_s16 = inlined_call_operand.vmem [shape: f32[2,1,128], index: 16, kind: input, shape index: {}]   ;;  %s4495_s17 = inlined_call_operand.vmem [shape: bf16[2,128,32], index: 17, kind: input, shape index: {}]   ;;  %s4496_s18 = inlined_call_operand.vmem [shape: f32[2,1,32], index: 18, kind: input, shape index: {}]   ;;  %s4497_s19 = inlined_call_operand.vmem [shape: f32[1,32], index: 19, kind: input, shape index: {}]   ;;  %s4498_s20 = inlined_call_operand.vmem [shape: f32[1,32], index: 20, kind: input, shape index: {}]   ;;  %s4499_s21 = inlined_call_operand.vmem [shape: bf16[32,128], index: 21, kind: input, shape index: {}]   ;;  %s4500_s22 = inlined_call_operand.hbm [shape: f32[2,1,128], index: 22, kind: output, shape index: {}]  }
   0x1   :  { %4526 = sst [smem:[#allocation12_spill]] %s4478_s0 }
   0x2   :  { %4527 = sst [smem:[#allocation13_spill]] %s4479_s1 }
   0x3   :  { %4528 = sst [smem:[#allocation14_spill]] %s4480_s2 }
   0x4   :  { %4529 = sst [smem:[#allocation15_spill]] %s4481_s3 }
   0x5   :  { %4530 = sst [smem:[#allocation16_spill]] %s4482_s4 }
   0x6   :  { %4531 = sst [smem:[#allocation17_spill]] %s4483_s5 }
   0x7   :  { %4532 = sst [smem:[#allocation18_spill]] %s4484_s6 }
   0x8   :  { %4533 = sst [smem:[#allocation19_spill]] %s4485_s7 }
   0x9   :  { %4534 = sst [smem:[#allocation20_spill]] %s4486_s8 }
   0xa   :  { %4535 = sst [smem:[#allocation21_spill]] %s4487_s9 }
   0xb   :  { %4536 = sst [smem:[#allocation22_spill]] %s4498_s20 }
   0xc   :  { %4537 = sst [smem:[#allocation23_spill]] %s4500_s22 }
   0xd   :  { %27 = vsyncpa [#allocation3], 0 }
   0xe   :  { %29 = vsyncpa [#allocation3 + $0x1], 0  ;;  %s3926_s3 = smov 0   ;;  %s3928_s28 = smov 0  }
   0xf   :  { %s3930_s29 = smov 0   ;;  %s3932_s30 = smov 0  }
  0x10 LB: > { %4538 = sst [smem:[#allocation5_spill]] %s3786_s3  ;;  %s3947_s4 = sadd.s32 4294967295, %s3798_s30   ;;  %s3798_s30 = sphi %s3932_s30, %s4573_s30   ;;  %s3794_s29 = sphi %s3930_s29, %s4575_s29   ;;  %s3790_s28 = sphi %s3928_s28, %s4577_s28   ;;  %s3786_s3 = sphi %s3926_s3, %s4576_s3  }
  0x11   : > { %4539 = sst [smem:[#allocation6_spill]] %s3794_s29  ;;  %s3280_s0 = sadd.s32 4294967294, %s3798_s30  }
  0x12   : > { %4540 = sst [smem:[#allocation7_spill]] %s3798_s30  ;;  %s3951_s23 = sadd.s32 1, %s3798_s30  }
  0x13   : > { %4541 = sst [smem:[#allocation8_spill]] %s3951_s23  ;;  %s509_s1 = sadd.s32 1, %s3794_s29 }
  0x14   : > { %s506_s5 = ssub.s32 %s3798_s30, %s3951_s23  ;;  %p519_p0 = scmp.ne.s32.totalorder %s3794_s29, %s3790_s28 }
  0x15   : > { %p507_p1 = scmp.eq.s32.totalorder %s506_s5, 0  ;;  %p520_p2 = scmp.eq.s32.totalorder %s3947_s4, 1 }
  0x16   : > { %p525_p3 = scmp.ne.s32.totalorder %s3790_s28, %s3786_s3  ;;  %p526_p4 = scmp.eq.s32.totalorder %s3280_s0, 1 }
  0x17   : > { %s3962_s24 = scalar_select %p507_p1, %s3794_s29, %s509_s1  }
  0x18   : > { %p3964_p5 = por %p520_p2, %p519_p0  ;;  %p3968_p6 = por %p526_p4, %p525_p3 }
  0x19   : > { %4542 = sst [smem:[#allocation9_spill]] %s3962_s24  ;;  %p3283_p7 = scmp.ge.s32.totalorder %s3798_s30, 1 }
  0x1a   : > { %s4543_s6 = scalar_select %p3964_p5, 1, 0 }
  0x1b   : > { %s4545_s25 = scalar_select %p3968_p6, 1, 0 }
  0x1c   : > { %4544 = sst [smem:[#allocation10_spill]] %s4543_s6  ;;  %p614_p8 = scmp.lt.s32.totalorder %s3798_s30, 3 }
  0x1d   : > { %4546 = sst [smem:[#allocation11_spill]] %s4545_s25 }
  0x1e   : > { %p615_p9 = pnand %p3283_p7, %p614_p8 }
  0x1f   : > { %p674_p10 = scmp.lt.s32.totalorder (!%p615_p9), %s3947_s4, 1  ;;  %s4547_s27 = sld [smem:[#allocation13_spill]] (!%p615_p9) }
  0x20   : > { %618 = sbr.rel (%p615_p9) target bundleno = 5506 (0x1582), region = 108  ;;  %s4548_s30 = sld [smem:[#allocation12_spill]] (!%p615_p9) }
  0x21   : > { %s4549_s2 = sld [smem:[#allocation14_spill]] (!%p615_p9)  ;;  %s4514_s0 = smov (!%p615_p9), 104  }
  0x22   : > { %s4550_s29 = sld [smem:[#allocation17_spill]] (!%p615_p9)  ;;  %s4521_s1 = smov (!%p615_p9), 112  }
  0x23   : > { %s4552_s7 = sld [smem:[#allocation19_spill]] (!%p615_p9)  ;;  %s4560_s6 = smov (!%p615_p9), 112  }
  0x24   : > { %s4553_s9 = sld [smem:[#allocation21_spill]] (!%p615_p9)  ;;  %s4565_s26 = smov (!%p615_p9), 8  }
  0x25   : > { %v695_v0 = vld [vmem:[%s4547_s27 + $0x38] sm:$0xff]  ;;  %v694_v1 = vld [vmem:[%s4547_s27 + $0x30] sm:$0xff]  ;;  %v3800_v2 = vmov 0   ;;  %s675_s5 = scalar_select %p674_p10, %s3947_s4, 1  ;;  %v693_v3 = vld [vmem:[%s4547_s27 + $0x28] sm:$0xff]  ;;  %v680_v10 = vlaneseq  ;;  %vm697_vm0 = vcmask 523264  }
  0x26   : > { %3613 = vset.pattern.permute.xlu0 %v3800_v2  ;;  %709 = vmatpush.msra.mxu0 %v695_v0  ;;  %v692_v4 = vld [vmem:[%s4547_s27 + $0x20] sm:$0xff]  ;;  %v691_v5 = vld [vmem:[%s4547_s27 + $0x18] sm:$0xff]  ;;  %v690_v7 = vld [vmem:[%s4547_s27 + $0x10] sm:$0xff]  ;;  %v3801_v13 = vmov 0.0   ;;  %vm727_vm2 = vcmask 261120   ;;  %v3802_v19 = vmov 32.0  }
  0x27   : > { %s3284_s23 = sshll.u32 %s675_s5, 3  ;;  %v689_v8 = vld [vmem:[%s4547_s27 + $0x8] sm:$0xff]  ;;  %v688_v9 = vld [vmem:[%s4547_s27] sm:$0xff]  ;;  %v4007_v11 = vand.u32 127, %v680_v10  ;;  %3683 = vrcp.f32 %v3802_v19  ;;  %s4554_s3 = sld [smem:[#allocation15_spill]]  ;;  %vm1023_vm7 = vcmask 64512  }
  0x28   : > { %710 = vmatpush.msra.mxu0 %v694_v1  ;;  %s3991_s22 = scalar_lea.vmem %s4548_s30, %s3284_s23  ;;  %v696_v15 = vld [vmem:[%s4549_s2] sm:$0xff]  ;;  %s4551_s24 = smov %s4550_s29  ;;  %v3526_v31 = vld [vmem:[%s4550_s29 + $0x8] sm:$0xff] }
  0x29   : > { %v679_v6 = vld [vmem:[%s3991_s22] sm:$0xff]  ;;  %v3528_v32 = vld [vmem:[%s4552_s7 + $0x8] sm:$0xff]  ;;  %795 = vmatpush.bf16.msra.mxu3 %v3526_v31  ;;  %s4556_s5 = sld [smem:[#allocation16_spill]]  ;;  %s4516_s27 = smov 120  }
  0x2a   : > { %711 = vmatpush.msra.mxu0 %v693_v3  ;;  %683 = vperm.xlu0 %3613, %v679_v6   ;;  %v3525_v33 = vld [vmem:[%s4551_s24] sm:$0xff]  ;;  %v3530_v35 = vld [vmem:[%s4553_s9 + $0x8] sm:$0xff]  ;;  %s4557_s8 = sld [smem:[#allocation20_spill]]  ;;  %s4519_s29 = smov 24  }
  0x2b   : > { %828 = vmatpush.bf16.msra.mxu2 %v3528_v32  ;;  %v3527_v34 = vld [vmem:[%s4552_s7] sm:$0xff]  ;;  %s4558_s30 = sld [smem:[#allocation18_spill]]  ;;  %s4561_s2 = smov 120  }
  0x2c   : > { %712 = vmatpush.msra.mxu0 %v692_v4  ;;  %v3529_v38 = vld [vmem:[%s4553_s9] sm:$0xff]  ;;  %s672_s20 = sand.u32 1, %s3790_s28  }
  0x2d   : > { %v3684_v20 = vpop.eup %3683  ;;  %796 = vmatpush.bf16.msra.mxu3 %v3525_v33  ;;  %s4555_s25 = smov %s4554_s3  ;;  %v3663_v46 = vld [vmem:[%s4554_s3] ss:$0 sm:$0xff]  ;;  %s4520_s3 = smov 16  }
  0x2e   : > { %713 = vmatpush.msra.mxu0 %v691_v5  ;;  %v732_v21 = vmul.f32 32.0, %v3684_v20  ;;  %vm736_vm3 = vweird.f32 %v3684_v20  ;;  %v3667_v4 = vld [vmem:[%s4488_s10] ss:$0 sm:$0xff] }
  0x2f   : > { %829 = vmatpush.bf16.msra.mxu2 %v3527_v34  ;;  %v3664_v49 = vld [vmem:[%s4556_s5] ss:$0 sm:$0xff] }
  0x30   : > { %714 = vmatpush.msra.mxu0 %v690_v7  ;;  %v733_v22 = vsub.f32 1.0, %v732_v21  ;;  %v3666_v53 = vld [vmem:[%s4557_s8] ss:$0 sm:$0xff] }
  0x31   : > { %861 = vmatpush.bf16.msrb.mxu3 %v3530_v35  ;;  %s4559_s23 = smov %s4558_s30  ;;  %v3665_v59 = vld [vmem:[%s4558_s30] ss:$0 sm:$0xff]  ;;  %s4518_s30 = smov 8  }
  0x32   : > { %715 = vmatpush.msra.mxu0 %v689_v8  ;;  %v734_v23 = vmul.f32 %v3684_v20, %v733_v22 }
  0x34   : > { %716 = vmatpush.msra.mxu0 %v688_v9  ;;  %v735_v24 = vadd.f32 %v3684_v20, %v734_v23 }
  0x35   : > { %862 = vmatpush.bf16.msrb.mxu3 %v3529_v38 }
  0x36   : > { %v4018_v25 = vsel %vm736_vm3, %v3684_v20, %v735_v24  ;;  %v4075_v20 = vshrl.u32 %v680_v10, 7 }
  0x38   : > { %vm723_vm8 = vcmp.gt.s32.totalorder %v4007_v11, %v4075_v20 }
  0x39   : > { %v4080_v21 = vsel %vm723_vm8, -1e+30, %v3801_v13 }
  0x9c   : > { %v684_v12 = vpop.permute.xlu0 %683 }
  0x9d   : > { %vm685_vm1 = vcmp.eq.s32.totalorder %v684_v12, %v4007_v11 }
  0x9e   : > { %v3285_v14 = vsel %vm685_vm1, 1.0, %v3801_v13 }
  0x9f   : > { %3286 = vmatmul.msk.f32.vlgmr.msra.gmra.mxu0 %vm697_vm0, %v3285_v14 }
 0x11c   : > { %v718_v16 = vpop.f32.mrf.mxu0 }
 0x11d   : > { %v4014_v17 = vadd.f32 %v718_v16, %v696_v15 }
 0x11f   : > { %v728_v18 = vsel %vm727_vm2, %v4014_v17, 0.0 }
 0x120   : > { %729 = vadd.xlane.f32.xlu0 %v728_v18 }
 0x193   : > { %v730_v26 = vpop.xlane.xlu0 %729 }
 0x194   : > { %v738_v27 = vmul.f32 %v4018_v25, %v730_v26 }
 0x196   : > { %v739_v28 = vsub.f32 %v4014_v17, %v738_v27 }
 0x198   : > { %v740_v29 = vmul.f32 %v739_v28, %v739_v28 }
 0x19a   : > { %v741_v30 = vsel %vm727_vm2, %v740_v29, 0.0 }
 0x19b   : > { %742 = vadd.xlane.f32.xlu1 %v741_v30 }
 0x20e   : > { %v743_v36 = vpop.xlane.xlu1 %742 }
 0x20f   : > { %v744_v37 = vmul.f32 %v743_v36, %v4018_v25 }
 0x211   : > { %v745_v39 = vadd.f32 1e-05, %v744_v37 }
 0x213   : > { %3685 = vrsqrt.f32 %v745_v39  ;;  %vm752_vm5 = vweird.f32 %v745_v39 }
 0x219   : > { %v3686_v40 = vpop.eup %3685 }
 0x21a   : > { %v747_v41 = vmul.f32 %v3686_v40, %v745_v39  ;;  %vm753_vm4 = vweird.f32 %v3686_v40 }
 0x21b   : > { %vm754_vm6 = vmor %vm752_vm5, %vm753_vm4 }
 0x21c   : > { %v748_v42 = vmul.f32 %v3686_v40, %v747_v41 }
 0x21e   : > { %v749_v43 = vmul.f32 0.5, %v748_v42 }
 0x220   : > { %v750_v44 = vsub.f32 1.5, %v749_v43 }
 0x222   : > { %v751_v45 = vmul.f32 %v3686_v40, %v750_v44 }
 0x224   : > { %v755_v47 = vsel %vm754_vm6, %v3686_v40, %v751_v45 }
 0x225   : > { %v756_v48 = vmul.f32 %v755_v47, %v739_v28 }
 0x227   : > { %v760_v50 = vmul.f32 %v3663_v46, %v756_v48 }
 0x229   : > { %v764_v51 = vadd.f32 %v3664_v49, %v760_v50 }
 0x22b   : > { %v765_v52 = vpack.c.bf16 %v764_v51, %v764_v51 }
 0x22d   : > { %3295 = vmatmul.msk.bf16.vlgmr.msra.gmra.mxu3 %vm727_vm2, %v765_v52  ;;  %3304 = vmatmul.msk.bf16.vlgmr.msra.gmra.mxu2 %vm727_vm2, %v765_v52 }
 0x23d   : > { %3313 = vmatmul.msk.bf16.vlgmr.msrb.gmra.mxu3 %vm727_vm2, %v765_v52 }
 0x2b0   : > { %v798_v54 = vpop.f32.mrf.mxu3  ;;  %v831_v55 = vpop.f32.mrf.mxu2 }
 0x2b1   : > { %v832_v56 = vadd.f32 %v3666_v53, %v831_v55  ;;  %v799_v61 = vadd.f32 %v3665_v59, %v798_v54 }
 0x2b3   : > { %882 = vrot.lane.b32.xlu2 %v832_v56, %s4514_s0  ;;  %879 = vrot.lane.b32.xlu1 %v832_v56, %s4521_s1 }
 0x2b8   : > { %v800_v57 = vpop.f32.mrf.mxu3  ;;  %v833_v58 = vpop.f32.mrf.mxu2 }
 0x2bb   : > { %876 = vrot.lane.b32.xlu2 %v832_v56, %s4516_s27 }
 0x2c0   : > { %v864_v60 = vpop.f32.mrf.mxu3 }
 0x2c1   : > { %v4066_v5 = vadd.f32 %v3667_v4, %v864_v60 }
 0x2c3   : > { %871 = vrot.lane.b32.xlu2 %v799_v61, %s4521_s1 }
 0x2c8   : > { %v866_v62 = vpop.f32.mrf.mxu3 }
 0x2cb   : > { %873 = vrot.lane.b32.xlu2 %v799_v61, %s4514_s0 }
 0x2d3   : > { %869 = vrot.lane.b32.xlu2 %v799_v61, %s4516_s27 }
 0x30d   : > { %v883_v63 = vpop.permute.xlu2 %882 }
 0x315   : > { %v877_v0 = vpop.permute.xlu2 %876 }
 0x316   : > { %v3621_v1 = vpack.i.bf16 %v877_v0, %v832_v56 }
 0x318   : > { %3622 = vxpose.xlu2.b32.start.end [1/1] (short) (narrow) %v3621_v1, 8 }
 0x31d   : > { %v872_v6 = vpop.permute.xlu2 %871 }
 0x325   : > { %v880_v2 = vpop.permute.xlu1 %879  ;;  %v874_v7 = vpop.permute.xlu2 %873 }
 0x326   : > { %v3614_v3 = vpack.i.bf16 %v883_v63, %v880_v2 }
 0x328   : > { %3615 = vxpose.xlu1.b32.start.end [1/1] (short) (narrow) %v3614_v3, 8 }
 0x32d   : > { %v870_v8 = vpop.permute.xlu2 %869 }
 0x382   : > { %889 = vrot.lane.b32.xlu1 %v4066_v5, %s4521_s1  ;;  %s3213_s1 = scalar_lea.sflag [#allocation3], %s672_s20 }
 0x3b1   : > { %v3623_v9 = vpop.trf.xlu2 }
 0x3b2   : > { %v3624_v12 = vunpack.i.l.bf16 %v3623_v9  ;;  %v3627_v14 = vunpack.i.h.bf16 %v3623_v9 }
 0x3b4   : > { %1041 = vmatpush.msrb.mxu0 %v3624_v12  ;;  %1063 = vmatpush.msra.mxu1 %v3627_v14 }
 0x3b5   : > { %3314 = vmatmul.msk.f32.vlgmr.msrb.gmra.mxu0 %vm1023_vm7, %v799_v61  ;;  %3315 = vmatmul.msk.f32.vlgmr.msra.gmra.mxu1 %vm1023_vm7, %v870_v8 }
 0x3cc   : > { %v3616_v15 = vpop.trf.xlu1 }
 0x3cd   : > { %v3620_v16 = vunpack.i.h.bf16 %v3616_v15  ;;  %v3617_v18 = vunpack.i.l.bf16 %v3616_v15 }
 0x3cf   : > { %1085 = vmatpush.msrb.mxu2 %v3617_v18  ;;  %1107 = vmatpush.msra.mxu3 %v3620_v16 }
 0x3d0   : > { %3316 = vmatmul.msk.f32.vlgmr.msrb.gmra.mxu2 %vm1023_vm7, %v872_v6  ;;  %3317 = vmatmul.msk.f32.vlgmr.msra.gmra.mxu3 %vm1023_vm7, %v874_v7 }
 0x3f4   : > { %v890_v19 = vpop.permute.xlu1 %889 }
 0x3f5   : > { %1280 = vxpose.xlu1.b32.start.end [1/1] (short) (narrow) %v890_v19, 8 }
 0x432   : > { %v1043_v22 = vpop.f32.mrf.mxu0  ;;  %v1065_v24 = vpop.f32.mrf.mxu1 }
 0x433   : > { %v1112_v23 = vmul.f32 0.35355338, %v1043_v22  ;;  %v1113_v27 = vmul.f32 0.35355338, %v1065_v24 }
 0x435   : > { %v1116_v26 = vadd.f32 %v1112_v23, %v4080_v21  ;;  %v1117_v29 = vadd.f32 %v1113_v27, %v4080_v21 }
 0x437   : > { %v1120_v28 = vsel %vm1023_vm7, %v1116_v26, -inf  ;;  %v1123_v10 = vsel %vm1023_vm7, %v1117_v29, -inf }
 0x438   : > { %1121 = vmax.xlane.f32.xlu0 %v1120_v28 }
 0x440   : > { %1124 = vmax.xlane.f32.xlu0 %v1123_v10 }
 0x453   : > { %v1087_v30 = vpop.f32.mrf.mxu2  ;;  %v1109_v11 = vpop.f32.mrf.mxu3 }
 0x454   : > { %v1114_v31 = vmul.f32 0.35355338, %v1087_v30  ;;  %v1115_v33 = vmul.f32 0.35355338, %v1109_v11 }
 0x456   : > { %v1118_v32 = vadd.f32 %v1114_v31, %v4080_v21  ;;  %v1119_v35 = vadd.f32 %v1115_v33, %v4080_v21 }
 0x458   : > { %v1126_v34 = vsel %vm1023_vm7, %v1118_v32, -inf  ;;  %v1129_v36 = vsel %vm1023_vm7, %v1119_v35, -inf }
 0x459   : > { %1127 = vmax.xlane.f32.xlu0 %v1126_v34 }
 0x461   : > { %1130 = vmax.xlane.f32.xlu0 %v1129_v36 }
 0x499   : > { %v1296_v24 = vpop.trf.xlu1 }
 0x4ab   : > { %v1122_v37 = vpop.xlane.xlu0 %1121 }
 0x4ac   : > { %v1132_v38 = vsub.f32 %v1116_v26, %v1122_v37 }
 0x4ae   : > { %v1136_v39 = vmul.f32 1.442695, %v1132_v38 }
 0x4b0   : > { %3687 = vpow2.f32 %v1136_v39 }
 0x4b3   : > { %v1125_v42 = vpop.xlane.xlu0 %1124 }
 0x4b4   : > { %v1133_v48 = vsub.f32 %v1117_v29, %v1125_v42 }
 0x4b6   : > { %v3688_v40 = vpop.eup %3687  ;;  %v1138_v49 = vmul.f32 1.442695, %v1133_v48 }
 0x4b7   : > { %v1144_v41 = vsel %vm1023_vm7, %v3688_v40, 0.0 }
 0x4b8   : > { %1145 = vadd.xlane.f32.xlu0 %v1144_v41 }
 0x4cc   : > { %892 = vrot.lane.b32.xlu0 %v4066_v5, %s4514_s0  ;;  %v1128_v43 = vpop.xlane.xlu0 %1127 }
 0x4cd   : > { %v1134_v44 = vsub.f32 %v1118_v32, %v1128_v43 }
 0x4cf   : > { %v1140_v45 = vmul.f32 1.442695, %v1134_v44 }
 0x4d1   : > { %3689 = vpow2.f32 %v1140_v45 }
 0x4d2   : > { %3691 = vpow2.f32 %v1138_v49 }
 0x4d4   : > { %v1131_v50 = vpop.xlane.xlu0 %1130 }
 0x4d5   : > { %v1135_v51 = vsub.f32 %v1119_v35, %v1131_v50 }
 0x4d7   : > { %v3690_v46 = vpop.eup %3689  ;;  %v1142_v52 = vmul.f32 1.442695, %v1135_v51 }
 0x4d8   : > { %v1150_v47 = vsel %vm1023_vm7, %v3690_v46, 0.0  ;;  %v4094_v53 = vpop.eup %3691 }
 0x4d9   : > { %1151 = vadd.xlane.f32.xlu2 %v1150_v47  ;;  %3693 = vpow2.f32 %v1142_v52  ;;  %v1147_v54 = vsel %vm1023_vm7, %v4094_v53, 0.0 }
 0x4df   : > { %v4098_v55 = vpop.eup %3693 }
 0x4e0   : > { %v1153_v56 = vsel %vm1023_vm7, %v4098_v55, 0.0 }
 0x4f6   : > { %1148 = vadd.xlane.f32.xlu0 %v1147_v54 }
 0x4fe   : > { %1154 = vadd.xlane.f32.xlu0 %v1153_v56 }
 0x502   : > { %1216 = vxpose.xlu2.b32.start.end [1/1] (short) (narrow) %v4066_v5, 8 }
 0x512   : > { %886 = vrot.lane.b32.xlu0 %v4066_v5, %s4516_s27  ;;  %s4564_s27 = smov 24  }
 0x52b   : > { %v1146_v57 = vpop.xlane.xlu0 %1145 }
 0x52c   : > { %3695 = vrcp.f32 %v1146_v57  ;;  %v1167_v61 = vand.u32 2147483648, %v1146_v57  ;;  %v1165_v63 = vand.u32 2147483647, %v1146_v57  ;;  %vm1161_vm10 = vweird.f32 %v1146_v57 }
 0x52e   : > { %v1168_v1 = vor.u32 1.1754944e-38, %v1167_v61  ;;  %vm1166_vm12 = vcmp.eq.f32.partialorder %v1165_v63, 8.507059e+37  ;;  %v3806_v61 = vmov 1983009808  }
 0x532   : > { %v3696_v58 = vpop.eup %3695 }
 0x533   : > { %v1157_v59 = vmul.f32 %v3696_v58, %v1146_v57  ;;  %vm1162_vm9 = vweird.f32 %v3696_v58 }
 0x534   : > { %vm1163_vm11 = vmor %vm1161_vm10, %vm1162_vm9 }
 0x535   : > { %v1158_v60 = vsub.f32 1.0, %v1157_v59 }
 0x537   : > { %v1159_v62 = vmul.f32 %v3696_v58, %v1158_v60 }
 0x539   : > { %v1160_v0 = vadd.f32 %v3696_v58, %v1159_v62  ;;  %v1582_v62 = vunpack.c.l.s4 %v3806_v61 }
 0x53b   : > { %v1164_v2 = vsel %vm1163_vm11, %v3696_v58, %v1160_v0  ;;  %vm1577_vm11 = vcmask 1047556  }
 0x53c   : > { %v1169_v3 = vsel %vm1166_vm12, %v1168_v1, %v1164_v2  ;;  %v4115_v1 = vunpack.c.0.s8 %v1582_v62  ;;  %vm1700_vm12 = vcmask 130048  }
 0x53d   : > { %v1170_v4 = vmul.f32 %v3688_v40, %v1169_v3 }
 0x53e   : > { %v893_v6 = vpop.permute.xlu0 %892 }
 0x53f   : > { %3318 = vmatpush.xpose.msk.msra.mxu0 %vm1023_vm7, %v1170_v4  ;;  %1312 = vxpose.xlu0.b32.start.end [1/1] (short) (narrow) %v893_v6, 8  ;;  %v3807_v4 = vmov 1934713408  }
 0x540   : > { %v1606_v6 = vunpack.c.l.s4 %v3807_v4 }
 0x54c   : > { %v1152_v5 = vpop.xlane.xlu2 %1151 }
 0x54d   : > { %3697 = vrcp.f32 %v1152_v5  ;;  %v1197_v12 = vand.u32 2147483648, %v1152_v5  ;;  %v1195_v15 = vand.u32 2147483647, %v1152_v5  ;;  %vm1191_vm14 = vweird.f32 %v1152_v5 }
 0x54f   : > { %v1198_v18 = vor.u32 1.1754944e-38, %v1197_v12  ;;  %vm1196_vm0 = vcmp.eq.f32.partialorder %v1195_v15, 8.507059e+37 }
 0x553   : > { %v3698_v7 = vpop.eup %3697 }
 0x554   : > { %v1187_v8 = vmul.f32 %v3698_v7, %v1152_v5  ;;  %vm1192_vm13 = vweird.f32 %v3698_v7 }
 0x555   : > { %vm1193_vm15 = vmor %vm1191_vm14, %vm1192_vm13  ;;  %vm1702_vm13 = vcmask 195584  }
 0x556   : > { %v1188_v9 = vsub.f32 1.0, %v1187_v8 }
 0x558   : > { %v1189_v14 = vmul.f32 %v3698_v7, %v1188_v9 }
 0x55a   : > { %v1190_v16 = vadd.f32 %v3698_v7, %v1189_v14 }
 0x55c   : > { %v1194_v19 = vsel %vm1193_vm15, %v3698_v7, %v1190_v16  ;;  %v4121_v16 = vunpack.c.0.s8 %v1606_v6 }
 0x55d   : > { %v1199_v22 = vsel %vm1196_vm0, %v1198_v18, %v1194_v19 }
 0x55e   : > { %v1200_v23 = vmul.f32 %v3690_v46, %v1199_v22 }
 0x560   : > { %3322 = vmatpush.xpose.msk.msra.mxu2 %vm1023_vm7, %v1200_v23 }
 0x563   : > { %3323 = vmatmul.msk.f32.vlgmr.msra.gmra.mxu2 %vm1023_vm7, %v1296_v24 }
 0x569   : > { %v1149_v26 = vpop.xlane.xlu0 %1148 }
 0x56a   : > { %3699 = vrcp.f32 %v1149_v26  ;;  %v1182_v30 = vand.u32 2147483648, %v1149_v26  ;;  %v1180_v11 = vand.u32 2147483647, %v1149_v26  ;;  %vm1176_vm3 = vweird.f32 %v1149_v26 }
 0x56c   : > { %v1183_v34 = vor.u32 1.1754944e-38, %v1182_v30  ;;  %vm1181_vm5 = vcmp.eq.f32.partialorder %v1180_v11, 8.507059e+37 }
 0x570   : > { %v3700_v27 = vpop.eup %3699 }
 0x571   : > { %v1172_v28 = vmul.f32 %v3700_v27, %v1149_v26  ;;  %v1155_v29 = vpop.xlane.xlu0 %1154  ;;  %vm1177_vm1 = vweird.f32 %v3700_v27 }
 0x572   : > { %3701 = vrcp.f32 %v1155_v29  ;;  %vm1178_vm4 = vmor %vm1176_vm3, %vm1177_vm1  ;;  %v1212_v40 = vand.u32 2147483648, %v1155_v29  ;;  %v1210_v42 = vand.u32 2147483647, %v1155_v29  ;;  %vm1206_vm8 = vweird.f32 %v1155_v29 }
 0x573   : > { %v1173_v10 = vsub.f32 1.0, %v1172_v28 }
 0x574   : > { %v1213_v44 = vor.u32 1.1754944e-38, %v1212_v40  ;;  %vm1211_vm10 = vcmp.eq.f32.partialorder %v1210_v42, 8.507059e+37 }
 0x575   : > { %v1174_v31 = vmul.f32 %v3700_v27, %v1173_v10 }
 0x577   : > { %v1175_v32 = vadd.f32 %v3700_v27, %v1174_v31 }
 0x578   : > { %v3702_v33 = vpop.eup %3701 }
 0x579   : > { %v1202_v35 = vmul.f32 %v3702_v33, %v1155_v29  ;;  %v1179_v36 = vsel %vm1178_vm4, %v3700_v27, %v1175_v32  ;;  %vm1207_vm6 = vweird.f32 %v3702_v33 }
 0x57a   : > { %v1184_v37 = vsel %vm1181_vm5, %v1183_v34, %v1179_v36  ;;  %vm1208_vm9 = vmor %vm1206_vm8, %vm1207_vm6 }
 0x57b   : > { %v1203_v38 = vsub.f32 1.0, %v1202_v35  ;;  %v1185_v39 = vmul.f32 %v4094_v53, %v1184_v37 }
 0x57d   : > { %v1204_v41 = vmul.f32 %v3702_v33, %v1203_v38  ;;  %3320 = vmatpush.xpose.msk.msrb.mxu1 %vm1023_vm7, %v1185_v39 }
 0x57f   : > { %v1205_v43 = vadd.f32 %v3702_v33, %v1204_v41 }
 0x581   : > { %v1209_v45 = vsel %vm1208_vm9, %v3702_v33, %v1205_v43 }
 0x582   : > { %v1214_v46 = vsel %vm1211_vm10, %v1213_v44, %v1209_v45 }
 0x583   : > { %v1215_v47 = vmul.f32 %v4098_v55, %v1214_v46 }
 0x584   : > { %v887_v48 = vpop.permute.xlu0 %886 }
 0x585   : > { %3324 = vmatpush.xpose.msk.msrb.mxu3 %vm1023_vm7, %v1215_v47  ;;  %1248 = vxpose.xlu0.b32.start.end [1/1] (short) (narrow) %v887_v48, 8 }
 0x59b   : > { %v1232_v49 = vpop.trf.xlu2 }
 0x59c   : > { %3319 = vmatmul.msk.f32.vlgmr.msra.gmra.mxu0 %vm1023_vm7, %v1232_v49 }
 0x5e3   : > { %v1328_v50 = vpop.trf.xlu0 }
 0x5e4   : > { %3325 = vmatmul.msk.f32.vlgmr.msrb.gmra.mxu3 %vm1023_vm7, %v1328_v50 }
 0x5e6   : > { %v1419_v52 = vpop.f32.mrf.mxu2 }
 0x619   : > { %v1367_v53 = vpop.f32.mrf.mxu0 }
 0x61a   : > { %v3628_v54 = vpack.i.bf16 %v1367_v53, %v1419_v52 }
 0x61c   : > { %3629 = vxpose.xlu0.b32.start.end [1/1] (short) (narrow) %v3628_v54, 8 }
 0x629   : > { %v1264_v51 = vpop.trf.xlu0 }
 0x62a   : > { %3321 = vmatmul.msk.f32.vlgmr.msrb.gmra.mxu1 %vm1023_vm7, %v1264_v51 }
 0x667   : > { %v1445_v56 = vpop.f32.mrf.mxu3 }
 0x6a7   : > { %v1393_v57 = vpop.f32.mrf.mxu1 }
 0x6a8   : > { %v3635_v55 = vpack.i.bf16 %v1393_v57, %v1445_v56 }
 0x6aa   : > { %3636 = vxpose.xlu1.b32.start.end [1/1] (short) (narrow) %v3635_v55, 8 }
 0x6c0   : > { %v3630_v58 = vpop.trf.xlu0 }
 0x6c1   : > { %v3634_v59 = vunpack.i.h.bf16 %v3630_v58  ;;  %v3631_v60 = vunpack.i.l.bf16 %v3630_v58 }
 0x6c3   : > { %v1579_v63 = vrot.slane %v3634_v59, 4  ;;  %v1576_v0 = vrot.slane %v3631_v60, 4 }
 0x6c5   : > { %v1578_v2 = vsel %vm1577_vm11, %v1576_v0, %v3634_v59  ;;  %v1580_v3 = vsel %vm1577_vm11, %v3631_v60, %v1579_v63 }
 0x6c6   : > { %v1584_v9 = vperm.slane %v1578_v2, %v4115_v1  ;;  %v1588_v12 = vperm.slane %v1580_v3, %v4115_v1 }
 0x6c8   : > { %v1603_v22 = vrot.slane %v1584_v9, 4  ;;  %v1615_v23 = vrot.slane %v1588_v12, 4 }
 0x74e   : > { %v3637_v5 = vpop.trf.xlu1 }
 0x74f   : > { %v3641_v7 = vunpack.i.h.bf16 %v3637_v5  ;;  %v3638_v8 = vunpack.i.l.bf16 %v3637_v5 }
 0x751   : > { %v1591_v14 = vrot.slane %v3641_v7, 4  ;;  %v1589_v15 = vrot.slane %v3638_v8, 4 }
 0x753   : > { %v1590_v18 = vsel %vm1577_vm11, %v1589_v15, %v3641_v7  ;;  %v1592_v19 = vsel %vm1577_vm11, %v3638_v8, %v1591_v14  ;;  %v3531_v14 = vld [vmem:[%s4489_s11] sm:$0xff] }
 0x754   : > { %v1596_v24 = vperm.slane %v1590_v18, %v4115_v1  ;;  %v1600_v26 = vperm.slane %v1592_v19, %v4115_v1 }
 0x756   : > { %v1601_v27 = vrot.slane %v1596_v24, 4  ;;  %v1604_v28 = vsel %vm1577_vm11, %v1596_v24, %v1603_v22  ;;  %v1613_v29 = vrot.slane %v1600_v26, 4  ;;  %v1616_v10 = vsel %vm1577_vm11, %v1600_v26, %v1615_v23 }
 0x757   : > { %v1612_v30 = vperm.slane %v1604_v28, %v4121_v16  ;;  %v1624_v31 = vperm.slane %v1616_v10, %v4121_v16 }
 0x758   : > { %v1602_v11 = vsel %vm1577_vm11, %v1601_v27, %v1584_v9  ;;  %v1614_v32 = vsel %vm1577_vm11, %v1613_v29, %v1588_v12  ;;  %v3532_v12 = vld [vmem:[%s4489_s11 + $0x8] sm:$0xff]  ;;  %v3668_v27 = vld [vmem:[%s4490_s12] ss:$0 sm:$0xff] }
 0x759   : > { %v1608_v33 = vperm.slane %v1602_v11, %v4121_v16  ;;  %v1620_v34 = vperm.slane %v1614_v32, %v4121_v16  ;;  %v1627_v35 = vrot.slane %v1612_v30, 4  ;;  %v1631_v36 = vrot.slane %v1624_v31, 4  ;;  %1730 = vmatpush.bf16.msrb.mxu0 %v3532_v12 }
 0x75b   : > { %v1628_v37 = vsel %vm1577_vm11, 0.0, %v1627_v35  ;;  %v1625_v38 = vrot.slane %v1608_v33, 4  ;;  %v1629_v39 = vrot.slane %v1620_v34, 4  ;;  %v1632_v40 = vsel %vm1577_vm11, 0.0, %v1631_v36 }
 0x75c   : > { %v1633_v41 = vsel %vm1577_vm11, %v1627_v35, %v1608_v33  ;;  %v1638_v42 = vrot.slane %v1628_v37, 4  ;;  %v1644_v43 = vsel %vm1577_vm11, %v1631_v36, %v1620_v34  ;;  %v1649_v44 = vrot.slane %v1632_v40, 4  ;;  %v3533_v36 = vld [vmem:[%s4493_s15] sm:$0xff] }
 0x75d   : > { %v1626_v45 = vsel %vm1577_vm11, 0.0, %v1625_v38  ;;  %v1630_v46 = vsel %vm1577_vm11, 0.0, %v1629_v39  ;;  %v1637_v47 = vperm.slane %v1633_v41, %v4115_v1  ;;  %v1648_v48 = vperm.slane %v1644_v43, %v4115_v1  ;;  %1731 = vmatpush.bf16.msrb.mxu0 %v3531_v14 }
 0x75e   : > { %v1639_v49 = vsel %vm1577_vm11, %v1638_v42, %v1626_v45  ;;  %v1650_v50 = vsel %vm1577_vm11, %v1649_v44, %v1630_v46  ;;  %v3669_v46 = vld [vmem:[%s4491_s13] ss:$0 sm:$0xff] }
 0x75f   : > { %v1643_v51 = vperm.slane %v1639_v49, %v4115_v1  ;;  %v1654_v52 = vperm.slane %v1650_v50, %v4115_v1  ;;  %v1657_v53 = vrot.slane %v1637_v47, 4  ;;  %v1669_v54 = vrot.slane %v1648_v48, 4  ;;  %v3670_v49 = vld [vmem:[%s4492_s14] ss:$0 sm:$0xff] }
 0x761   : > { %v1658_v56 = vsel %vm1577_vm11, %v1643_v51, %v1657_v53  ;;  %v1670_v57 = vsel %vm1577_vm11, %v1654_v52, %v1669_v54  ;;  %v1655_v55 = vrot.slane %v1643_v51, 4  ;;  %v1667_v58 = vrot.slane %v1654_v52, 4  ;;  %v3542_v53 = vld [vmem:[%s4495_s17 + $0x38] sm:$0xff]  ;;  %v3541_v54 = vld [vmem:[%s4495_s17 + $0x30] sm:$0xff] }
 0x762   : > { %v1666_v59 = vperm.slane %v1658_v56, %v4121_v16  ;;  %v1678_v60 = vperm.slane %v1670_v57, %v4121_v16  ;;  %1898 = vmatpush.bf16.msrb.mxu2 %v3542_v53  ;;  %v3540_v56 = vld [vmem:[%s4495_s17 + $0x28] sm:$0xff]  ;;  %v3539_v57 = vld [vmem:[%s4495_s17 + $0x20] sm:$0xff] }
 0x763   : > { %v1656_v61 = vsel %vm1577_vm11, %v1655_v55, %v1637_v47  ;;  %v1668_v62 = vsel %vm1577_vm11, %v1667_v58, %v1648_v48  ;;  %v3538_v55 = vld [vmem:[%s4495_s17 + $0x18] sm:$0xff]  ;;  %v3537_v58 = vld [vmem:[%s4495_s17 + $0x10] sm:$0xff] }
 0x764   : > { %v1685_v63 = vrot.slane %v1666_v59, 4  ;;  %v1683_v0 = vrot.slane %v1678_v60, 4  ;;  %v1662_v2 = vperm.slane %v1656_v61, %v4121_v16  ;;  %v1674_v3 = vperm.slane %v1668_v62, %v4121_v16 }
 0x766   : > { %v1686_v4 = vsel %vm1577_vm11, %v1678_v60, %v1685_v63  ;;  %v1684_v6 = vsel %vm1577_vm11, %v1683_v0, %v1666_v59  ;;  %v1679_v5 = vrot.slane %v1674_v3, 4  ;;  %v1681_v7 = vrot.slane %v1662_v2, 4  ;;  %1899 = vmatpush.bf16.msrb.mxu2 %v3541_v54  ;;  %v3671_v59 = vld [vmem:[%s4494_s16] ss:$0 sm:$0xff]  ;;  %v3536_v60 = vld [vmem:[%s4495_s17 + $0x8] sm:$0xff] }
 0x767   : > { %1696 = vrot.lane.b32.xlu1 %v1686_v4, %s4519_s29  ;;  %1692 = vrot.lane.b32.xlu2 %v1684_v6, %s4520_s3  ;;  %v3535_v63 = vld [vmem:[%s4495_s17] sm:$0xff]  ;;  %s4562_s29 = smov 104  }
 0x768   : > { %v1682_v8 = vsel %vm1577_vm11, %v1674_v3, %v1681_v7  ;;  %v1680_v9 = vsel %vm1577_vm11, %v1679_v5, %v1662_v2 }
 0x769   : > { %1688 = vrot.lane.b32.xlu0 %v1682_v8, %s4518_s30 }
 0x76a   : > { %1900 = vmatpush.bf16.msrb.mxu2 %v3540_v56 }
 0x76e   : > { %1901 = vmatpush.bf16.msrb.mxu2 %v3539_v57  ;;  %v3675_v57 = vld [vmem:[%s4557_s8 + $0x1] ss:$0 sm:$0xff] }
 0x772   : > { %1902 = vmatpush.bf16.msrb.mxu2 %v3538_v55 }
 0x776   : > { %1903 = vmatpush.bf16.msrb.mxu2 %v3537_v58 }
 0x77a   : > { %1904 = vmatpush.bf16.msrb.mxu2 %v3536_v60  ;;  %v3677_v60 = vld [vmem:[%s4559_s23 + $0x1] ss:$0 sm:$0xff] }
 0x77e   : > { %1905 = vmatpush.bf16.msrb.mxu2 %v3535_v63 }
 0x7c1   : > { %v1693_v18 = vpop.permute.xlu2 %1692 }
 0x7d9   : > { %v1697_v22 = vpop.permute.xlu1 %1696 }
 0x7db   : > { %v1689_v15 = vpop.permute.xlu0 %1688 }
 0x7dc   : > { %v1699_v19 = vsel %vm1023_vm7, %v1680_v9, %v1689_v15 }
 0x7dd   : > { %v1701_v23 = vsel %vm1700_vm12, %v1699_v19, %v1693_v18 }
 0x7de   : > { %v1703_v24 = vsel %vm1702_vm13, %v1701_v23, %v1697_v22 }
 0x7df   : > { %v1704_v26 = vpack.c.bf16 %v1703_v24, %v1703_v24 }
 0x7e1   : > { %3334 = vmatmul.msk.bf16.vlgmr.msrb.gmra.mxu0 %vm727_vm2, %v1704_v26  ;;  %v3672_v26 = vld [vmem:[%s4496_s18] ss:$0 sm:$0xff] }
 0x85e   : > { %v1733_v28 = vpop.f32.mrf.mxu0 }
 0x85f   : > { %v1737_v29 = vadd.f32 %v1733_v28, %v4014_v17  ;;  %v3534_v17 = vld [vmem:[%s4493_s15 + $0x8] sm:$0xff] }
 0x860   : > { %1805 = vmatpush.bf16.msra.mxu1 %v3534_v17  ;;  %v3546_v17 = vld [vmem:[%s4552_s7 + $0x18] sm:$0xff] }
 0x861   : > { %v4176_v10 = vadd.f32 %v3668_v27, %v1737_v29  ;;  %2018 = vmatpush.bf16.msra.mxu0 %v3546_v17  ;;  %v3676_v17 = vld [vmem:[%s4488_s10 + $0x1] ss:$0 sm:$0xff] }
 0x863   : > { %v1745_v30 = vsel %vm727_vm2, %v4176_v10, 0.0 }
 0x864   : > { %1746 = vadd.xlane.f32.xlu1 %v1745_v30  ;;  %1806 = vmatpush.bf16.msra.mxu1 %v3533_v36  ;;  %v3548_v36 = vld [vmem:[%s4553_s9 + $0x18] sm:$0xff] }
 0x866   : > { %v1735_v31 = vpop.f32.mrf.mxu0 }
 0x868   : > { %2053 = vmatpush.bf16.msrb.mxu1 %v3548_v36 }
 0x8d7   : > { %v1747_v11 = vpop.xlane.xlu1 %1746 }
 0x8d8   : > { %v1748_v32 = vmul.f32 %v1747_v11, %v4018_v25 }
 0x8da   : > { %v1749_v33 = vsub.f32 %v4176_v10, %v1748_v32 }
 0x8dc   : > { %v1750_v34 = vmul.f32 %v1749_v33, %v1749_v33 }
 0x8de   : > { %v1751_v35 = vsel %vm727_vm2, %v1750_v34, 0.0 }
 0x8df   : > { %1752 = vadd.xlane.f32.xlu2 %v1751_v35 }
 0x952   : > { %v1753_v37 = vpop.xlane.xlu2 %1752 }
 0x953   : > { %v1754_v38 = vmul.f32 %v1753_v37, %v4018_v25  ;;  %v3543_v37 = vld [vmem:[%s4551_s24 + $0x10] sm:$0xff] }
 0x955   : > { %v1755_v39 = vadd.f32 1e-05, %v1754_v38  ;;  %v3545_v38 = vld [vmem:[%s4552_s7 + $0x10] sm:$0xff]  ;;  %s673_s7 = scalar_lea.vmem [#allocation2], %s672_s20 }
 0x956   : > { %2019 = vmatpush.bf16.msra.mxu0 %v3545_v38  ;;  %s3223_s3 = sshll.u32 %s673_s7, 4  ;;  %s3224_s3 = int_to_ptr.vmem [resolvable:$true] %s3223_s3 }
 0x957   : > { %3703 = vrsqrt.f32 %v1755_v39  ;;  %vm1762_vm15 = vweird.f32 %v1755_v39 }
 0x95d   : > { %v3704_v40 = vpop.eup %3703 }
 0x95e   : > { %v1757_v41 = vmul.f32 %v3704_v40, %v1755_v39  ;;  %vm1763_vm14 = vweird.f32 %v3704_v40  ;;  %v3547_v39 = vld [vmem:[%s4553_s9 + $0x10] sm:$0xff] }
 0x95f   : > { %vm1764_vm0 = vmor %vm1762_vm15, %vm1763_vm14  ;;  %2054 = vmatpush.bf16.msrb.mxu1 %v3547_v39 }
 0x960   : > { %v1758_v42 = vmul.f32 %v3704_v40, %v1757_v41 }
 0x962   : > { %v1759_v43 = vmul.f32 0.5, %v1758_v42 }
 0x964   : > { %v1760_v44 = vsub.f32 1.5, %v1759_v43 }
 0x966   : > { %v1761_v45 = vmul.f32 %v3704_v40, %v1760_v44 }
 0x968   : > { %v1765_v47 = vsel %vm1764_vm0, %v3704_v40, %v1761_v45 }
 0x969   : > { %v1766_v48 = vmul.f32 %v1765_v47, %v1749_v33 }
 0x96b   : > { %v1770_v50 = vmul.f32 %v3669_v46, %v1766_v48 }
 0x96d   : > { %v1774_v51 = vadd.f32 %v3670_v49, %v1770_v50  ;;  %v3673_v49 = vld [vmem:[%s4555_s25 + $0x1] ss:$0 sm:$0xff] }
 0x96f   : > { %v1775_v52 = vpack.c.bf16 %v1774_v51, %v1774_v51 }
 0x971   : > { %3343 = vmatmul.msk.bf16.vlgmr.msra.gmra.mxu1 %vm727_vm2, %v1775_v52  ;;  %v3674_v52 = vld [vmem:[%s4556_s5 + $0x1] ss:$0 sm:$0xff] }
 0x9ee   : > { %v1808_v61 = vpop.f32.mrf.mxu1 }
 0x9ef   : > { %v1809_v62 = vadd.f32 %v3671_v59, %v1808_v61 }
 0x9f1   : > { %v3344_v0 = vmul.f32 -1.702, %v1809_v62 }
 0x9f3   : > { %v1814_v2 = vmul.f32 1.442695, %v3344_v0 }
 0x9f5   : > { %3705 = vpow2.f32 %v1814_v2 }
 0x9f6   : > { %v1810_v3 = vpop.f32.mrf.mxu1 }
 0x9fb   : > { %v3706_v4 = vpop.eup %3705 }
 0x9fc   : > { %v1816_v6 = vadd.f32 1.0, %v3706_v4 }
 0x9fe   : > { %3707 = vrcp.f32 %v1816_v6  ;;  %v1828_v9 = vand.u32 2147483648, %v1816_v6  ;;  %v1826_v14 = vand.u32 2147483647, %v1816_v6  ;;  %vm1822_vm3 = vweird.f32 %v1816_v6 }
 0xa00   : > { %v1829_v18 = vor.u32 1.1754944e-38, %v1828_v9  ;;  %vm1827_vm5 = vcmp.eq.f32.partialorder %v1826_v14, 8.507059e+37 }
 0xa04   : > { %v3708_v5 = vpop.eup %3707 }
 0xa05   : > { %v1818_v7 = vmul.f32 %v3708_v5, %v1816_v6  ;;  %vm1823_vm1 = vweird.f32 %v3708_v5 }
 0xa06   : > { %vm1824_vm4 = vmor %vm1822_vm3, %vm1823_vm1 }
 0xa07   : > { %v1819_v8 = vsub.f32 1.0, %v1818_v7 }
 0xa09   : > { %v1820_v12 = vmul.f32 %v3708_v5, %v1819_v8 }
 0xa0b   : > { %v1821_v15 = vadd.f32 %v3708_v5, %v1820_v12 }
 0xa0d   : > { %v1825_v19 = vsel %vm1824_vm4, %v3708_v5, %v1821_v15 }
 0xa0e   : > { %v1830_v22 = vsel %vm1827_vm5, %v1829_v18, %v1825_v19 }
 0xa0f   : > { %v1832_v23 = vmul.f32 %v1830_v22, %v1809_v62 }
 0xa11   : > { %v1833_v24 = vpack.c.bf16 %v1832_v23, %v1832_v23 }
 0xa13   : > { %1906 = vmatmul.bf16.vlgmr.msrb.gmra.mxu2 %v1833_v24 }
 0xa96   : > { %v1907_v27 = vpop.f32.mrf.mxu2 }
 0xa97   : > { %v1911_v28 = vadd.f32 %v1907_v27, %v4176_v10  ;;  %v3544_v10 = vld [vmem:[%s4551_s24 + $0x18] sm:$0xff] }
 0xa98   : > { %1983 = vmatpush.bf16.msra.mxu3 %v3544_v10 }
 0xa99   : > { %v4228_v29 = vadd.f32 %v3672_v26, %v1911_v28 }
 0xa9b   : > { %v1921_v30 = vsel %vm727_vm2, %v4228_v29, 0.0 }
 0xa9c   : > { %1922 = vadd.xlane.f32.xlu0 %v1921_v30  ;;  %1984 = vmatpush.bf16.msra.mxu3 %v3543_v37 }
 0xa9e   : > { %v1909_v31 = vpop.f32.mrf.mxu2 }
 0xb0f   : > { %v1923_v11 = vpop.xlane.xlu0 %1922 }
 0xb10   : > { %v1924_v32 = vmul.f32 %v1923_v11, %v4018_v25 }
 0xb12   : > { %v1925_v33 = vsub.f32 %v4228_v29, %v1924_v32 }
 0xb14   : > { %v1926_v34 = vmul.f32 %v1925_v33, %v1925_v33 }
 0xb16   : > { %v1927_v35 = vsel %vm727_vm2, %v1926_v34, 0.0 }
 0xb17   : > { %1928 = vadd.xlane.f32.xlu1 %v1927_v35 }
 0xb8a   : > { %v1929_v40 = vpop.xlane.xlu1 %1928 }
 0xb8b   : > { %v1930_v41 = vmul.f32 %v1929_v40, %v4018_v25 }
 0xb8d   : > { %v1931_v42 = vadd.f32 1e-05, %v1930_v41 }
 0xb8f   : > { %3709 = vrsqrt.f32 %v1931_v42  ;;  %vm1938_vm8 = vweird.f32 %v1931_v42 }
 0xb95   : > { %v3710_v43 = vpop.eup %3709 }
 0xb96   : > { %v1933_v44 = vmul.f32 %v3710_v43, %v1931_v42  ;;  %vm1939_vm6 = vweird.f32 %v3710_v43 }
 0xb97   : > { %vm1940_vm9 = vmor %vm1938_vm8, %vm1939_vm6 }
 0xb98   : > { %v1934_v45 = vmul.f32 %v3710_v43, %v1933_v44 }
 0xb9a   : > { %v1935_v46 = vmul.f32 0.5, %v1934_v45 }
 0xb9c   : > { %v1936_v47 = vsub.f32 1.5, %v1935_v46 }
 0xb9e   : > { %v1937_v48 = vmul.f32 %v3710_v43, %v1936_v47 }
 0xba0   : > { %v1941_v50 = vsel %vm1940_vm9, %v3710_v43, %v1937_v48 }
 0xba1   : > { %v1942_v51 = vmul.f32 %v1941_v50, %v1925_v33 }
 0xba3   : > { %v1946_v53 = vmul.f32 %v3673_v49, %v1942_v51 }
 0xba5   : > { %v1950_v54 = vadd.f32 %v3674_v52, %v1946_v53 }
 0xba7   : > { %v1951_v56 = vpack.c.bf16 %v1950_v54, %v1950_v54 }
 0xba9   : > { %3392 = vmatmul.msk.bf16.vlgmr.msra.gmra.mxu3 %vm727_vm2, %v1951_v56  ;;  %3406 = vmatmul.msk.bf16.vlgmr.msra.gmra.mxu0 %vm727_vm2, %v1951_v56 }
 0xbaa   : > { %3420 = vmatmul.msk.bf16.vlgmr.msrb.gmra.mxu1 %vm727_vm2, %v1951_v56 }
 0xc26   : > { %v2021_v55 = vpop.f32.mrf.mxu0 }
 0xc27   : > { %v2022_v58 = vadd.f32 %v3675_v57, %v2021_v55  ;;  %v2056_v59 = vpop.f32.mrf.mxu1 }
 0xc28   : > { %v2057_v38 = vadd.f32 %v3676_v17, %v2056_v59 }
 0xc29   : > { %2071 = vrot.lane.b32.xlu0 %v2022_v58, %s4560_s6  ;;  %2068 = vrot.lane.b32.xlu2 %v2022_v58, %s4561_s2 }
 0xc2a   : > { %2074 = vrot.lane.b32.xlu1 %v2022_v58, %s4562_s29 }
 0xc2c   : > { %v1986_v61 = vpop.f32.mrf.mxu3 }
 0xc2d   : > { %v1987_v63 = vadd.f32 %v3677_v60, %v1986_v61 }
 0xc2e   : > { %v2023_v62 = vpop.f32.mrf.mxu0 }
 0xc2f   : > { %v2058_v0 = vpop.f32.mrf.mxu1 }
 0xc31   : > { %2065 = vrot.lane.b32.xlu0 %v1987_v63, %s4562_s29  ;;  %2063 = vrot.lane.b32.xlu2 %v1987_v63, %s4560_s6 }
 0xc32   : > { %2061 = vrot.lane.b32.xlu1 %v1987_v63, %s4561_s2 }
 0xc34   : > { %v1988_v2 = vpop.f32.mrf.mxu3 }
 0xc53   : > { %2087 = vxpose.xlu0.b32.start.end [1/1] (short) (narrow) %v2022_v58, 8 }
 0xc83   : > { %v2069_v4 = vpop.permute.xlu2 %2068 }
 0xc8b   : > { %v2064_v9 = vpop.permute.xlu2 %2063 }
 0xc9b   : > { %v2072_v3 = vpop.permute.xlu0 %2071 }
 0xc9c   : > { %v2075_v6 = vpop.permute.xlu1 %2074  ;;  %2151 = vxpose.xlu2.b32.start.end [1/1] (short) (narrow) %v2072_v3, 8 }
 0xc9d   : > { %v3642_v5 = vpack.i.bf16 %v2069_v4, %v2075_v6 }
 0xc9f   : > { %3643 = vxpose.xlu1.b32.start.end [1/1] (short) (narrow) %v3642_v5, 8 }
 0xca3   : > { %v2066_v7 = vpop.permute.xlu0 %2065 }
 0xca4   : > { %v2062_v14 = vpop.permute.xlu1 %2061 }
 0xcf7   : > { %v2103_v8 = vpop.trf.xlu0 }
 0xcf8   : > { %2232 = vmatpush.msrb.mxu3 %v2103_v8 }
 0xcf9   : > { %3421 = vmatmul.msk.f32.vlgmr.msrb.gmra.mxu3 %vm1023_vm7, %v1987_v63 }
 0xd35   : > { %v2167_v12 = vpop.trf.xlu2 }
 0xd36   : > { %2276 = vmatpush.msrb.mxu0 %v2167_v12 }
 0xd37   : > { %3423 = vmatmul.msk.f32.vlgmr.msrb.gmra.mxu0 %vm1023_vm7, %v2064_v9 }
 0xd43   : > { %v3644_v15 = vpop.trf.xlu1 }
 0xd44   : > { %v3648_v18 = vunpack.i.h.bf16 %v3644_v15  ;;  %v3645_v19 = vunpack.i.l.bf16 %v3644_v15 }
 0xd46   : > { %2254 = vmatpush.msra.mxu3 %v3648_v18  ;;  %2298 = vmatpush.msra.mxu1 %v3645_v19 }
 0xd47   : > { %3422 = vmatmul.msk.f32.vlgmr.msra.gmra.mxu3 %vm1023_vm7, %v2062_v14  ;;  %3424 = vmatmul.msk.f32.vlgmr.msra.gmra.mxu1 %vm1023_vm7, %v2066_v7 }
 0xd7c   : > { %v2234_v22 = vpop.f32.mrf.mxu3 }
 0xd7d   : > { %v2303_v23 = vmul.f32 0.35355338, %v2234_v22 }
 0xd7f   : > { %v2307_v24 = vadd.f32 %v2303_v23, %v4080_v21 }
 0xd81   : > { %v2311_v26 = vsel %vm1023_vm7, %v2307_v24, -inf }
 0xd82   : > { %2312 = vmax.xlane.f32.xlu0 %v2311_v26 }
 0xdb4   : > { %v2278_v27 = vpop.f32.mrf.mxu0 }
 0xdb5   : > { %v2305_v28 = vmul.f32 0.35355338, %v2278_v27 }
 0xdb7   : > { %v2309_v30 = vadd.f32 %v2305_v28, %v4080_v21 }
 0xdb9   : > { %v2317_v31 = vsel %vm1023_vm7, %v2309_v30, -inf }
 0xdba   : > { %2318 = vmax.xlane.f32.xlu1 %v2317_v31 }
 0xdc4   : > { %v2300_v11 = vpop.f32.mrf.mxu1 }
 0xdc5   : > { %v2306_v32 = vmul.f32 0.35355338, %v2300_v11 }
 0xdc7   : > { %v2310_v33 = vadd.f32 %v2306_v32, %v4080_v21 }
 0xdc9   : > { %v2320_v34 = vsel %vm1023_vm7, %v2310_v33, -inf }
 0xdca   : > { %v2256_v35 = vpop.f32.mrf.mxu3  ;;  %2321 = vmax.xlane.f32.xlu2 %v2320_v34 }
 0xdcb   : > { %v2304_v10 = vmul.f32 0.35355338, %v2256_v35 }
 0xdcd   : > { %v2308_v36 = vadd.f32 %v2304_v10, %v4080_v21 }
 0xdcf   : > { %v2314_v37 = vsel %vm1023_vm7, %v2308_v36, -inf }
 0xdd0   : > { %2315 = vmax.xlane.f32.xlu0 %v2314_v37 }
 0xdd3   : > { %2084 = vrot.lane.b32.xlu1 %v2057_v38, %s4562_s29  ;;  %s4568_s29 = sld [smem:[#allocation23_spill]] }
 0xdd9   : > { %s4569_s5 = smov %s4568_s29  ;;  %s3221_s30 = scalar_lea.hbm %s4568_s29, %s3947_s4 }
 0xdda   : > { %s3225_s0 = sshll.u32 %s3221_s30, 4  ;;  %s3226_s0 = int_to_ptr.hbm [resolvable:$true] %s3225_s0 }
 0xdf5   : > { %v2313_v39 = vpop.xlane.xlu0 %2312 }
 0xdf6   : > { %v2323_v40 = vsub.f32 %v2307_v24, %v2313_v39 }
 0xdf8   : > { %v2327_v41 = vmul.f32 1.442695, %v2323_v40 }
 0xdfa   : > { %3711 = vpow2.f32 %v2327_v41 }
 0xe00   : > { %v3712_v42 = vpop.eup %3711 }
 0xe01   : > { %v2335_v43 = vsel %vm1023_vm7, %v3712_v42, 0.0 }
 0xe02   : > { %2336 = vadd.xlane.f32.xlu1 %v2335_v43 }
 0xe2d   : > { %v2319_v44 = vpop.xlane.xlu1 %2318 }
 0xe2e   : > { %v2325_v45 = vsub.f32 %v2309_v30, %v2319_v44 }
 0xe30   : > { %v2331_v46 = vmul.f32 1.442695, %v2325_v45 }
 0xe32   : > { %3713 = vpow2.f32 %v2331_v46 }
 0xe38   : > { %v3714_v47 = vpop.eup %3713 }
 0xe39   : > { %v2341_v21 = vsel %vm1023_vm7, %v3714_v47, 0.0 }
 0xe3a   : > { %2342 = vadd.xlane.f32.xlu0 %v2341_v21 }
 0xe3c   : > { %2407 = vxpose.xlu1.b32.start.end [1/1] (short) (narrow) %v2057_v38, 8 }
 0xe3d   : > { %v2322_v48 = vpop.xlane.xlu2 %2321 }
 0xe3e   : > { %v2326_v49 = vsub.f32 %v2310_v33, %v2322_v48 }
 0xe40   : > { %v2333_v50 = vmul.f32 1.442695, %v2326_v49 }
 0xe42   : > { %3715 = vpow2.f32 %v2333_v50 }
 0xe43   : > { %v2316_v51 = vpop.xlane.xlu0 %2315 }
 0xe44   : > { %v2324_v52 = vsub.f32 %v2308_v36, %v2316_v51 }
 0xe45   : > { %v2085_v58 = vpop.permute.xlu1 %2084 }
 0xe46   : > { %v2329_v53 = vmul.f32 1.442695, %v2324_v52 }
 0xe48   : > { %v4293_v54 = vpop.eup %3715  ;;  %3717 = vpow2.f32 %v2329_v53 }
 0xe49   : > { %v2344_v56 = vsel %vm1023_vm7, %v4293_v54, 0.0 }
 0xe4a   : > { %2345 = vadd.xlane.f32.xlu2 %v2344_v56 }
 0xe4e   : > { %v4297_v57 = vpop.eup %3717  ;;  %2081 = vrot.lane.b32.xlu0 %v2057_v38, %s4560_s6  ;;  %s3756_s6 = scalar_lea.hbm %s4569_s5, 2 }
 0xe4f   : > { %v2338_v55 = vsel %vm1023_vm7, %v4297_v57, 0.0 }
 0xe52   : > { %2339 = vadd.xlane.f32.xlu2 %v2338_v55 }
 0xe6a   : > { %2078 = vrot.lane.b32.xlu2 %v2057_v38, %s4561_s2 }
 0xe70   : > { %2503 = vxpose.xlu0.b32.start.end [1/1] (short) (narrow) %v2085_v58, 8 }
 0xe75   : > { %v2337_v59 = vpop.xlane.xlu1 %2336 }
 0xe76   : > { %3719 = vrcp.f32 %v2337_v59  ;;  %v2358_v63 = vand.u32 2147483648, %v2337_v59  ;;  %v2356_v2 = vand.u32 2147483647, %v2337_v59  ;;  %vm2352_vm14 = vweird.f32 %v2337_v59 }
 0xe78   : > { %v2359_v4 = vor.u32 1.1754944e-38, %v2358_v63  ;;  %vm2357_vm0 = vcmp.eq.f32.partialorder %v2356_v2, 8.507059e+37 }
 0xe7c   : > { %v3720_v60 = vpop.eup %3719 }
 0xe7d   : > { %v2348_v61 = vmul.f32 %v3720_v60, %v2337_v59  ;;  %vm2353_vm10 = vweird.f32 %v3720_v60 }
 0xe7e   : > { %vm2354_vm15 = vmor %vm2352_vm14, %vm2353_vm10 }
 0xe7f   : > { %v2349_v62 = vsub.f32 1.0, %v2348_v61  ;;  %v3735_v61 = vld [vmem:[%s3991_s22] sm:$0xff]  ;;  %s4563_s22 = smov 16  }
 0xe81   : > { %v2350_v0 = vmul.f32 %v3720_v60, %v2349_v62 }
 0xe83   : > { %v2351_v3 = vadd.f32 %v3720_v60, %v2350_v0 }
 0xe85   : > { %v2355_v6 = vsel %vm2354_vm15, %v3720_v60, %v2351_v3 }
 0xe86   : > { %v2360_v5 = vsel %vm2357_vm0, %v2359_v4, %v2355_v6 }
 0xe87   : > { %v2361_v7 = vmul.f32 %v3712_v42, %v2360_v5 }
 0xe89   : > { %3425 = vmatpush.xpose.msk.msrb.mxu3 %vm1023_vm7, %v2361_v7 }
 0xead   : > { %v2343_v8 = vpop.xlane.xlu0 %2342 }
 0xeae   : > { %3721 = vrcp.f32 %v2343_v8  ;;  %v2388_v15 = vand.u32 2147483648, %v2343_v8  ;;  %v2386_v19 = vand.u32 2147483647, %v2343_v8  ;;  %vm2382_vm3 = vweird.f32 %v2343_v8 }
 0xeb0   : > { %v2389_v23 = vor.u32 1.1754944e-38, %v2388_v15  ;;  %vm2387_vm5 = vcmp.eq.f32.partialorder %v2386_v19, 8.507059e+37 }
 0xeb4   : > { %v3722_v9 = vpop.eup %3721 }
 0xeb5   : > { %v2378_v12 = vmul.f32 %v3722_v9, %v2343_v8  ;;  %vm2383_vm1 = vweird.f32 %v3722_v9 }
 0xeb6   : > { %vm2384_vm4 = vmor %vm2382_vm3, %vm2383_vm1  ;;  %vm3113_vm3 = vcmask 7168  }
 0xeb7   : > { %v2379_v14 = vsub.f32 1.0, %v2378_v12  ;;  %v3114_v62 = vsel %vm3113_vm3, %v3735_v61, 2147483648 }
 0xeb8   : > { %v3115_v63 = vrot.slane %v3114_v62, 4 }
 0xeb9   : > { %v2380_v18 = vmul.f32 %v3722_v9, %v2379_v14 }
 0xebb   : > { %v2381_v22 = vadd.f32 %v3722_v9, %v2380_v18 }
 0xebd   : > { %v2385_v24 = vsel %vm2384_vm4, %v3722_v9, %v2381_v22  ;;  %v2346_v26 = vpop.xlane.xlu2 %2345  ;;  %vm3116_vm4 = vcmp.gt.s32.totalorder %v3114_v62, %v3115_v63 }
 0xebe   : > { %v2390_v27 = vsel %vm2387_vm5, %v2389_v23, %v2385_v24  ;;  %3723 = vrcp.f32 %v2346_v26  ;;  %v2403_v34 = vand.u32 2147483648, %v2346_v26  ;;  %v2401_v10 = vand.u32 2147483647, %v2346_v26 }
 0xebf   : > { %v2391_v28 = vmul.f32 %v3714_v47, %v2390_v27  ;;  %vm2397_vm8 = vweird.f32 %v2346_v26  ;;  %v3117_v0 = vsel %vm3116_vm4, %v3114_v62, %v3115_v63 }
 0xec0   : > { %v2082_v30 = vpop.permute.xlu0 %2081  ;;  %v2404_v37 = vor.u32 1.1754944e-38, %v2403_v34  ;;  %vm2402_vm10 = vcmp.eq.f32.partialorder %v2401_v10, 8.507059e+37  ;;  %v3118_v2 = vrot.slane %v3117_v0, 2 }
 0xec1   : > { %3429 = vmatpush.xpose.msk.msrb.mxu1 %vm1023_vm7, %v2391_v28  ;;  %2471 = vxpose.xlu2.b32.start.end [1/1] (short) (narrow) %v2082_v30, 8 }
 0xec2   : > { %vm3119_vm5 = vcmp.gt.s32.totalorder %v3117_v0, %v3118_v2 }
 0xec3   : > { %v3120_v3 = vsel %vm3119_vm5, %v3117_v0, %v3118_v2 }
 0xec4   : > { %v3724_v31 = vpop.eup %3723  ;;  %v3121_v4 = vrot.slane %v3120_v3, 1 }
 0xec5   : > { %v2393_v11 = vmul.f32 %v3724_v31, %v2346_v26  ;;  %v2340_v32 = vpop.xlane.xlu2 %2339  ;;  %vm2398_vm6 = vweird.f32 %v3724_v31 }
 0xec6   : > { %3725 = vrcp.f32 %v2340_v32  ;;  %vm2399_vm9 = vmor %vm2397_vm8, %vm2398_vm6  ;;  %v2373_v44 = vand.u32 2147483648, %v2340_v32  ;;  %v2371_v46 = vand.u32 2147483647, %v2340_v32  ;;  %vm2367_vm15 = vweird.f32 %v2340_v32 }
 0xec7   : > { %v2394_v33 = vsub.f32 1.0, %v2393_v11  ;;  %vm3122_vm6 = vcmp.gt.s32.totalorder %v3120_v3, %v3121_v4 }
 0xec8   : > { %v2374_v21 = vor.u32 1.1754944e-38, %v2373_v44  ;;  %vm2372_vm1 = vcmp.eq.f32.partialorder %v2371_v46, 8.507059e+37  ;;  %v3123_v6 = vsel %vm3122_vm6, %v3120_v3, %v3121_v4 }
 0xec9   : > { %v2395_v35 = vmul.f32 %v3724_v31, %v2394_v33  ;;  %vm3124_vm8 = vcmp.eq.s32.totalorder %v3735_v61, %v3123_v6 }
 0xeca   : > { %v3125_v7 = vsel %vm3124_vm8, %v4075_v20, 8 }
 0xecb   : > { %v2396_v17 = vadd.f32 %v3724_v31, %v2395_v35  ;;  %v3126_v12 = vsel %vm3113_vm3, %v3125_v7, 2147483647 }
 0xecc   : > { %v3726_v36 = vpop.eup %3725  ;;  %v3127_v18 = vrot.slane %v3126_v12, 4 }
 0xecd   : > { %v2400_v38 = vsel %vm2399_vm9, %v3724_v31, %v2396_v17  ;;  %v2363_v39 = vmul.f32 %v3726_v36, %v2340_v32  ;;  %v2079_v40 = vpop.permute.xlu2 %2078  ;;  %vm2368_vm14 = vweird.f32 %v3726_v36 }
 0xece   : > { %v2405_v41 = vsel %vm2402_vm10, %v2404_v37, %v2400_v38  ;;  %2439 = vxpose.xlu0.b32.start.end [1/1] (short) (narrow) %v2079_v40, 8  ;;  %vm2369_vm0 = vmor %vm2367_vm15, %vm2368_vm14  ;;  %vm3128_vm9 = vcmp.lt.s32.totalorder %v3126_v12, %v3127_v18 }
 0xecf   : > { %v2364_v42 = vsub.f32 1.0, %v2363_v39  ;;  %v2406_v43 = vmul.f32 %v4293_v54, %v2405_v41  ;;  %v3129_v30 = vsel %vm3128_vm9, %v3126_v12, %v3127_v18 }
 0xed0   : > { %v3130_v34 = vrot.slane %v3129_v30, 2 }
 0xed1   : > { %v2365_v45 = vmul.f32 %v3726_v36, %v2364_v42  ;;  %3431 = vmatpush.xpose.msk.msra.mxu2 %vm1023_vm7, %v2406_v43 }
 0xed2   : > { %vm3131_vm10 = vcmp.lt.s32.totalorder %v3129_v30, %v3130_v34 }
 0xed3   : > { %v2366_v47 = vadd.f32 %v3726_v36, %v2365_v45 }
 0xed5   : > { %v2370_v48 = vsel %vm2369_vm0, %v3726_v36, %v2366_v47 }
 0xed6   : > { %v2375_v49 = vsel %vm2372_vm1, %v2374_v21, %v2370_v48  ;;  %v3132_v48 = vsel %vm3131_vm10, %v3129_v30, %v3130_v34 }
 0xed7   : > { %v2376_v50 = vmul.f32 %v4297_v57, %v2375_v49  ;;  %v3133_v4 = vrot.slane %v3132_v48, 1 }
 0xed9   : > { %3427 = vmatpush.xpose.msk.msra.mxu0 %vm1023_vm7, %v2376_v50  ;;  %vm3134_vm14 = vcmp.lt.s32.totalorder %v3132_v48, %v3133_v4 }
 0xeda   : > { %v3135_v30 = vsel %vm3134_vm14, %v3132_v48, %v3133_v4  ;;  %v3556_v4 = vld [vmem:[%s4495_s17 + $0x58] sm:$0xff] }
 0xedb   : > { %vm3136_vm15 = vcmp.eq.s32.totalorder %v4075_v20, %v3135_v30 }
 0xee0   : > { %v2423_v51 = vpop.trf.xlu1 }
 0xee1   : > { %3426 = vmatmul.msk.f32.vlgmr.msrb.gmra.mxu3 %vm1023_vm7, %v2423_v51 }
 0xf14   : > { %v2519_v52 = vpop.trf.xlu0 }
 0xf15   : > { %3432 = vmatmul.msk.f32.vlgmr.msra.gmra.mxu2 %vm1023_vm7, %v2519_v52 }
 0xf5a   : > { %v2487_v53 = vpop.trf.xlu2 }
 0xf5b   : > { %3430 = vmatmul.msk.f32.vlgmr.msrb.gmra.mxu1 %vm1023_vm7, %v2487_v53 }
 0xf64   : > { %v2558_v56 = vpop.f32.mrf.mxu3 }
 0xf72   : > { %v2455_v54 = vpop.trf.xlu0 }
 0xf73   : > { %3428 = vmatmul.msk.f32.vlgmr.msra.gmra.mxu0 %vm1023_vm7, %v2455_v54 }
 0xf98   : > { %v2636_v59 = vpop.f32.mrf.mxu2 }
 0xfd8   : > { %v2610_v55 = vpop.f32.mrf.mxu1 }
 0xfd9   : > { %v3649_v58 = vpack.i.bf16 %v2558_v56, %v2610_v55 }
 0xfdb   : > { %3650 = vxpose.xlu0.b32.start.end [1/1] (short) (narrow) %v3649_v58, 8 }
 0xff0   : > { %v2584_v57 = vpop.f32.mrf.mxu0 }
 0xff1   : > { %v3656_v60 = vpack.i.bf16 %v2584_v57, %v2636_v59 }
 0xff3   : > { %3657 = vxpose.xlu2.b32.start.end [1/1] (short) (narrow) %v3656_v60, 8 }
0x107f   : > { %v3651_v5 = vpop.trf.xlu0 }
0x1080   : > { %v3655_v8 = vunpack.i.h.bf16 %v3651_v5  ;;  %v3652_v9 = vunpack.i.l.bf16 %v3651_v5 }
0x1082   : > { %v2769_v14 = vrot.slane %v3655_v8, 4  ;;  %v2767_v15 = vrot.slane %v3652_v9, 4 }
0x1084   : > { %v2768_v19 = vsel %vm1577_vm11, %v2767_v15, %v3655_v8  ;;  %v2770_v22 = vsel %vm1577_vm11, %v3652_v9, %v2769_v14 }
0x1085   : > { %v2774_v27 = vperm.slane %v2768_v19, %v4115_v1  ;;  %v2778_v28 = vperm.slane %v2770_v22, %v4115_v1 }
0x1087   : > { %v2793_v35 = vrot.slane %v2774_v27, 4  ;;  %v2805_v10 = vrot.slane %v2778_v28, 4 }
0x108c   : > { %v3658_v23 = vpop.trf.xlu2 }
0x108d   : > { %v3662_v24 = vunpack.i.h.bf16 %v3658_v23  ;;  %v3659_v26 = vunpack.i.l.bf16 %v3658_v23 }
0x108f   : > { %v2781_v31 = vrot.slane %v3662_v24, 4  ;;  %v2779_v11 = vrot.slane %v3659_v26, 4 }
0x1091   : > { %v2780_v32 = vsel %vm1577_vm11, %v2779_v11, %v3662_v24  ;;  %v2782_v33 = vsel %vm1577_vm11, %v3659_v26, %v2781_v31  ;;  %v3550_v11 = vld [vmem:[%s4489_s11 + $0x18] sm:$0xff] }
0x1092   : > { %v2786_v17 = vperm.slane %v2780_v32, %v4115_v1  ;;  %v2790_v36 = vperm.slane %v2782_v33, %v4115_v1  ;;  %2919 = vmatpush.bf16.msra.mxu3 %v3550_v11  ;;  %v3549_v32 = vld [vmem:[%s4489_s11 + $0x10] sm:$0xff] }
0x1094   : > { %v2791_v37 = vrot.slane %v2786_v17, 4  ;;  %v2794_v38 = vsel %vm1577_vm11, %v2786_v17, %v2793_v35  ;;  %v2803_v39 = vrot.slane %v2790_v36, 4  ;;  %v2806_v40 = vsel %vm1577_vm11, %v2790_v36, %v2805_v10  ;;  %v3678_v36 = vld [vmem:[%s4490_s12 + $0x1] ss:$0 sm:$0xff] }
0x1095   : > { %v2802_v41 = vperm.slane %v2794_v38, %v4121_v16  ;;  %v2814_v42 = vperm.slane %v2806_v40, %v4121_v16 }
0x1096   : > { %v2792_v43 = vsel %vm1577_vm11, %v2791_v37, %v2774_v27  ;;  %v2804_v44 = vsel %vm1577_vm11, %v2803_v39, %v2778_v28  ;;  %2920 = vmatpush.bf16.msra.mxu3 %v3549_v32 }
0x1097   : > { %v2798_v45 = vperm.slane %v2792_v43, %v4121_v16  ;;  %v2817_v46 = vrot.slane %v2802_v41, 4  ;;  %v2810_v47 = vperm.slane %v2804_v44, %v4121_v16  ;;  %v2821_v21 = vrot.slane %v2814_v42, 4 }
0x1099   : > { %v2815_v49 = vrot.slane %v2798_v45, 4  ;;  %v2818_v50 = vsel %vm1577_vm11, 0.0, %v2817_v46  ;;  %v2819_v51 = vrot.slane %v2810_v47, 4  ;;  %v2822_v52 = vsel %vm1577_vm11, 0.0, %v2821_v21 }
0x109a   : > { %v2828_v53 = vrot.slane %v2818_v50, 4  ;;  %v2823_v54 = vsel %vm1577_vm11, %v2817_v46, %v2798_v45  ;;  %v2834_v56 = vsel %vm1577_vm11, %v2821_v21, %v2810_v47  ;;  %v2839_v55 = vrot.slane %v2822_v52, 4  ;;  %v3551_v47 = vld [vmem:[%s4493_s15 + $0x10] sm:$0xff] }
0x109b   : > { %v2816_v58 = vsel %vm1577_vm11, 0.0, %v2815_v49  ;;  %v2820_v57 = vsel %vm1577_vm11, 0.0, %v2819_v51  ;;  %v2827_v59 = vperm.slane %v2823_v54, %v4115_v1  ;;  %v2838_v60 = vperm.slane %v2834_v56, %v4115_v1 }
0x109c   : > { %v2829_v61 = vsel %vm1577_vm11, %v2828_v53, %v2816_v58  ;;  %v2840_v62 = vsel %vm1577_vm11, %v2839_v55, %v2820_v57  ;;  %v3679_v55 = vld [vmem:[%s4491_s13 + $0x1] ss:$0 sm:$0xff] }
0x109d   : > { %v2833_v63 = vperm.slane %v2829_v61, %v4115_v1  ;;  %v2844_v0 = vperm.slane %v2840_v62, %v4115_v1  ;;  %v2847_v2 = vrot.slane %v2827_v59, 4  ;;  %v2859_v3 = vrot.slane %v2838_v60, 4 }
0x109f   : > { %v2845_v6 = vrot.slane %v2833_v63, 4  ;;  %v2857_v5 = vrot.slane %v2844_v0, 4  ;;  %v2848_v7 = vsel %vm1577_vm11, %v2833_v63, %v2847_v2  ;;  %v2860_v8 = vsel %vm1577_vm11, %v2844_v0, %v2859_v3  ;;  %v3560_v63 = vld [vmem:[%s4495_s17 + $0x78] sm:$0xff]  ;;  %v3559_v0 = vld [vmem:[%s4495_s17 + $0x70] sm:$0xff]  ;;  %v3558_v2 = vld [vmem:[%s4495_s17 + $0x68] sm:$0xff] }
0x10a0   : > { %v2856_v9 = vperm.slane %v2848_v7, %v4121_v16  ;;  %v2868_v12 = vperm.slane %v2860_v8, %v4121_v16  ;;  %3093 = vmatpush.bf16.msra.mxu1 %v3560_v63  ;;  %v3557_v3 = vld [vmem:[%s4495_s17 + $0x60] sm:$0xff]  ;;  %v3554_v7 = vld [vmem:[%s4495_s17 + $0x48] sm:$0xff] }
0x10a1   : > { %v2846_v14 = vsel %vm1577_vm11, %v2845_v6, %v2827_v59  ;;  %v2858_v15 = vsel %vm1577_vm11, %v2857_v5, %v2838_v60  ;;  %v3680_v59 = vld [vmem:[%s4492_s14 + $0x1] ss:$0 sm:$0xff]  ;;  %v3555_v6 = vld [vmem:[%s4495_s17 + $0x50] sm:$0xff] }
0x10a2   : > { %v2852_v18 = vperm.slane %v2846_v14, %v4121_v16  ;;  %v2864_v1 = vperm.slane %v2858_v15, %v4121_v16  ;;  %v2873_v19 = vrot.slane %v2868_v12, 4  ;;  %v2875_v22 = vrot.slane %v2856_v9, 4  ;;  %v3681_v5 = vld [vmem:[%s4494_s16 + $0x1] ss:$0 sm:$0xff] }
0x10a3   : > { %v3513_v16 = vsel %vm3136_vm15, 1.0, %v3801_v13 }
0x10a4   : > { %v2869_v23 = vrot.slane %v2864_v1, 4  ;;  %v2871_v24 = vrot.slane %v2852_v18, 4  ;;  %v2874_v26 = vsel %vm1577_vm11, %v2873_v19, %v2856_v9  ;;  %v2876_v27 = vsel %vm1577_vm11, %v2868_v12, %v2875_v22  ;;  %3094 = vmatpush.bf16.msra.mxu1 %v3559_v0  ;;  %v3553_v12 = vld [vmem:[%s4495_s17 + $0x40] sm:$0xff] }
0x10a5   : > { %2882 = vrot.lane.b32.xlu1 %v2874_v26, %s4563_s22  ;;  %2886 = vrot.lane.b32.xlu2 %v2876_v27, %s4564_s27  ;;  %s4566_s27 = sld [smem:[#allocation22_spill]]  ;;  %s3750_s22 = sshra.s32 %s3226_s0, 4  ;;  %s3751_s22 = int_to_ptr.hbm [resolvable:$true] %s3750_s22 }
0x10a6   : > { %v2872_v28 = vsel %vm1577_vm11, %v2864_v1, %v2871_v24  ;;  %v2870_v31 = vsel %vm1577_vm11, %v2869_v23, %v2852_v18  ;;  %p3757_p0 = scmp.lt.s32.totalorder %s3751_s22, %s4569_s5 }
0x10a7   : > { %2878 = vrot.lane.b32.xlu0 %v2872_v28, %s4565_s26 }
0x10a8   : > { %3095 = vmatpush.bf16.msra.mxu1 %v3558_v2 }
0x10ac   : > { %3096 = vmatpush.bf16.msra.mxu1 %v3557_v3 }
0x10af   : > { %3141 = vperm.xlu0 %3613, %v3513_v16  }
0x10b0   : > { %3097 = vmatpush.bf16.msra.mxu1 %v3556_v4 }
0x10b4   : > { %3098 = vmatpush.bf16.msra.mxu1 %v3555_v6 }
0x10b8   : > { %3099 = vmatpush.bf16.msra.mxu1 %v3554_v7 }
0x10bc   : > { %3100 = vmatpush.bf16.msra.mxu1 %v3553_v12 }
0x10ff   : > { %v2887_v10 = vpop.permute.xlu2 %2886 }
0x1117   : > { %v2883_v35 = vpop.permute.xlu1 %2882 }
0x1119   : > { %v2879_v33 = vpop.permute.xlu0 %2878 }
0x111a   : > { %v2889_v34 = vsel %vm1023_vm7, %v2870_v31, %v2879_v33 }
0x111b   : > { %v2890_v20 = vsel %vm1700_vm12, %v2889_v34, %v2883_v35  ;;  %v3682_v34 = vld [vmem:[%s4496_s18 + $0x1] ss:$0 sm:$0xff] }
0x111c   : > { %v2891_v13 = vsel %vm1702_vm13, %v2890_v20, %v2887_v10 }
0x111d   : > { %v2892_v17 = vpack.c.bf16 %v2891_v13, %v2891_v13 }
0x111f   : > { %3445 = vmatmul.msk.bf16.vlgmr.msra.gmra.mxu3 %vm727_vm2, %v2892_v17 }
0x1121   : > { %v3142_v13 = vpop.permute.xlu0 %3141 }
0x11a2   : > { %v2922_v37 = vpop.f32.mrf.mxu3 }
0x11a3   : > { %v2926_v38 = vadd.f32 %v2922_v37, %v4228_v29  ;;  %v3552_v29 = vld [vmem:[%s4493_s15 + $0x18] sm:$0xff] }
0x11a4   : > { %2999 = vmatpush.bf16.msrb.mxu0 %v3552_v29 }
0x11a5   : > { %v4376_v39 = vadd.f32 %v3678_v36, %v2926_v38 }
0x11a7   : > { %v2937_v40 = vsel %vm727_vm2, %v4376_v39, 0.0 }
0x11a8   : > { %2938 = vadd.xlane.f32.xlu1 %v2937_v40  ;;  %3000 = vmatpush.bf16.msrb.mxu0 %v3551_v47 }
0x11aa   : > { %v2924_v41 = vpop.f32.mrf.mxu3 }
0x121b   : > { %v2939_v42 = vpop.xlane.xlu1 %2938 }
0x121c   : > { %v2940_v43 = vmul.f32 %v2939_v42, %v4018_v25 }
0x121e   : > { %v2941_v44 = vsub.f32 %v4376_v39, %v2940_v43 }
0x1220   : > { %v2942_v45 = vmul.f32 %v2941_v44, %v2941_v44 }
0x1222   : > { %v2943_v46 = vsel %vm727_vm2, %v2942_v45, 0.0 }
0x1223   : > { %2944 = vadd.xlane.f32.xlu2 %v2943_v46 }
0x1296   : > { %v2945_v21 = vpop.xlane.xlu2 %2944 }
0x1297   : > { %v2946_v48 = vmul.f32 %v2945_v21, %v4018_v25 }
0x1299   : > { %v2947_v49 = vadd.f32 1e-05, %v2946_v48  ;;  %v3562_v48 = vld [vmem:[%s4499_s21 + $0x8] sm:$0xff] }
0x129a   : > { %3204 = vmatpush.bf16.msrb.mxu2 %v3562_v48 }
0x129b   : > { %3727 = vrsqrt.f32 %v2947_v49  ;;  %vm2954_vm11 = vweird.f32 %v2947_v49 }
0x12a1   : > { %v3728_v50 = vpop.eup %3727 }
0x12a2   : > { %v2949_v51 = vmul.f32 %v3728_v50, %v2947_v49  ;;  %vm2955_vm7 = vweird.f32 %v3728_v50  ;;  %v3561_v49 = vld [vmem:[%s4499_s21] sm:$0xff] }
0x12a3   : > { %vm2956_vm12 = vmor %vm2954_vm11, %vm2955_vm7  ;;  %3205 = vmatpush.bf16.msrb.mxu2 %v3561_v49 }
0x12a4   : > { %v2950_v52 = vmul.f32 %v3728_v50, %v2949_v51 }
0x12a6   : > { %v2951_v53 = vmul.f32 0.5, %v2950_v52 }
0x12a8   : > { %v2952_v54 = vsub.f32 1.5, %v2951_v53 }
0x12aa   : > { %v2953_v56 = vmul.f32 %v3728_v50, %v2952_v54 }
0x12ac   : > { %v2957_v58 = vsel %vm2956_vm12, %v3728_v50, %v2953_v56 }
0x12ad   : > { %v2958_v57 = vmul.f32 %v2957_v58, %v2941_v44 }
0x12af   : > { %v2962_v60 = vmul.f32 %v3679_v55, %v2958_v57 }
0x12b1   : > { %v2966_v61 = vadd.f32 %v3680_v59, %v2962_v60  ;;  %v3152_v59 = vld [vmem:[%s4497_s19] sm:$0x1] }
0x12b3   : > { %v2967_v62 = vpack.c.bf16 %v2966_v61, %v2966_v61 }
0x12b5   : > { %3462 = vmatmul.msk.bf16.vlgmr.msrb.gmra.mxu0 %vm727_vm2, %v2967_v62 }
0x1332   : > { %v3002_v8 = vpop.f32.mrf.mxu0 }
0x1333   : > { %v3003_v9 = vadd.f32 %v3681_v5, %v3002_v8 }
0x1335   : > { %v3463_v14 = vmul.f32 -1.702, %v3003_v9 }
0x1337   : > { %v3008_v15 = vmul.f32 1.442695, %v3463_v14 }
0x1339   : > { %3729 = vpow2.f32 %v3008_v15 }
0x133a   : > { %v3004_v18 = vpop.f32.mrf.mxu0 }
0x133f   : > { %v3730_v1 = vpop.eup %3729 }
0x1340   : > { %v3010_v19 = vadd.f32 1.0, %v3730_v1 }
0x1342   : > { %3731 = vrcp.f32 %v3010_v19  ;;  %v3022_v26 = vand.u32 2147483648, %v3010_v19  ;;  %v3020_v28 = vand.u32 2147483647, %v3010_v19  ;;  %vm3016_vm0 = vweird.f32 %v3010_v19 }
0x1344   : > { %v3023_v31 = vor.u32 1.1754944e-38, %v3022_v26  ;;  %vm3021_vm3 = vcmp.eq.f32.partialorder %v3020_v28, 8.507059e+37 }
0x1348   : > { %v3732_v22 = vpop.eup %3731 }
0x1349   : > { %v3012_v23 = vmul.f32 %v3732_v22, %v3010_v19  ;;  %vm3017_vm13 = vweird.f32 %v3732_v22 }
0x134a   : > { %vm3018_vm1 = vmor %vm3016_vm0, %vm3017_vm13 }
0x134b   : > { %v3013_v24 = vsub.f32 1.0, %v3012_v23 }
0x134d   : > { %v3014_v27 = vmul.f32 %v3732_v22, %v3013_v24 }
0x134f   : > { %v3015_v30 = vadd.f32 %v3732_v22, %v3014_v27 }
0x1351   : > { %v3019_v16 = vsel %vm3018_vm1, %v3732_v22, %v3015_v30 }
0x1352   : > { %v3024_v11 = vsel %vm3021_vm3, %v3023_v31, %v3019_v16 }
0x1353   : > { %v3026_v32 = vmul.f32 %v3024_v11, %v3003_v9 }
0x1355   : > { %v3027_v33 = vpack.c.bf16 %v3026_v32, %v3026_v32 }
0x1357   : > { %3101 = vmatmul.bf16.vlgmr.msra.gmra.mxu1 %v3027_v33 }
0x13d4   : > { %v3102_v35 = vpop.f32.mrf.mxu1 }
0x13d5   : > { %v3106_v10 = vadd.f32 %v3102_v35, %v4376_v39 }
0x13d7   : > { %v3112_v20 = vadd.f32 %v3682_v34, %v3106_v10 }
0x13d9   : > { %v3144_v17 = vmul.f32 %v3142_v13, %v3112_v20 }
0x13db   : > { %v3145_v36 = vsel %vm727_vm2, %v3144_v17, 0.0 }
0x13dc   : > { %v3146_v37 = vrot.slane %v3145_v36, 4  ;;  %v3104_v38 = vpop.f32.mrf.mxu1 }
0x13de   : > { %v3147_v40 = vadd.f32 %v3146_v37, %v3145_v36 }
0x13e0   : > { %v3148_v41 = vrot.slane %v3147_v40, 2 }
0x13e2   : > { %v3149_v42 = vadd.f32 %v3148_v41, %v3147_v40 }
0x13e4   : > { %v3150_v43 = vrot.slane %v3149_v42, 1 }
0x13e6   : > { %v3151_v44 = vadd.f32 %v3150_v43, %v3149_v42 }
0x13e8   : > { %v3154_v45 = vsel %vm727_vm2, %v3151_v44, 0.0 }
0x13e9   : > { %3155 = vadd.xlane.f32.xlu0 %v3154_v45 }
0x145c   : > { %v3156_v46 = vpop.xlane.xlu0 %3155 }
0x145d   : > { %v3157_v29 = vmul.f32 %v3156_v46, %v4018_v25 }
0x145f   : > { %v3158_v47 = vsub.f32 %v3151_v44, %v3157_v29 }
0x1461   : > { %v3159_v39 = vmul.f32 %v3158_v47, %v3158_v47 }
0x1463   : > { %v3160_v21 = vsel %vm727_vm2, %v3159_v39, 0.0 }
0x1464   : > { %3161 = vadd.xlane.f32.xlu1 %v3160_v21 }
0x14d7   : > { %v3162_v50 = vpop.xlane.xlu1 %3161 }
0x14d8   : > { %v3163_v51 = vmul.f32 %v3162_v50, %v4018_v25  ;;  %v3153_v25 = vld [vmem:[%s4566_s27] sm:$0x1]  ;;  %s3752_s27 = scalar_lea.hbm %s3751_s22, 1 }
0x14d9   : > { %p3753_p11 = scmp.ne.s32.totalorder %s3751_s22, %s3752_s27  ;;  %p3758_p1 = scmp.lt.s32.totalorder %s3756_s6, %s3752_s27 }
0x14da   : > { %v3164_v52 = vadd.f32 1e-05, %v3163_v51 }
0x14db   : > { %p3754_p12 = pnand %p3753_p11, %p3964_p5  ;;  %p3759_p2 = por %p3758_p1, %p3757_p0 }
0x14dc   : > { %3733 = vrsqrt.f32 %v3164_v52  ;;  %vm3171_vm5 = vweird.f32 %v3164_v52 }
0x14dd   : > { %p3755_p13 = pneg %p3754_p12 }
0x14df   : > { %p3760_p3 = pnand %p3759_p2, %p3755_p13 }
0x14e2   : > { %v3734_v53 = vpop.eup %3733 }
0x14e3   : > { %v3166_v54 = vmul.f32 %v3734_v53, %v3164_v52  ;;  %vm3172_vm4 = vweird.f32 %v3734_v53 }
0x14e4   : > { %vm3173_vm6 = vmor %vm3171_vm5, %vm3172_vm4 }
0x14e5   : > { %v3167_v56 = vmul.f32 %v3734_v53, %v3166_v54 }
0x14e7   : > { %v3168_v55 = vmul.f32 0.5, %v3167_v56 }
0x14e9   : > { %v3169_v58 = vsub.f32 1.5, %v3168_v55 }
0x14eb   : > { %v3170_v57 = vmul.f32 %v3734_v53, %v3169_v58 }
0x14ed   : > { %v3174_v60 = vsel %vm3173_vm6, %v3734_v53, %v3170_v57 }
0x14ee   : > { %v3175_v61 = vmul.f32 %v3174_v60, %v3158_v47 }
0x14f0   : > { %v3176_v62 = vmul.f32 %v3175_v61, %v3152_v59 }
0x14f2   : > { %v3177_v63 = vadd.f32 %v3176_v62, %v3153_v25 }
0x14f4   : > { %v3178_v0 = vpack.c.bf16 %v3177_v63, %v3177_v63 }
0x14f6   : > { %3522 = vmatmul.msk.bf16.vlgmr.msrb.gmra.mxu2 %vm727_vm2, %v3178_v0 }
0x1579   : > { %v3207_v2 = vpop.f32.mrf.mxu2 }
0x157a   : > { %3211 = vst [vmem:[%s673_s7] sm:$0x1] %v3207_v2 }
0x157b   : > { %3763 = shalt.err (!%p3760_p3)
}
0x157c   : > { %3563 = dma.vmem_to_hbm [thread:$0]  (%p3964_p5), %s3224_s3, 16, %s3226_s0, %s3213_s1  }
0x1581   : > { %v3209_v3 = vpop.f32.mrf.mxu2 }
0x1582 PF: > { %s4570_s7 = sld [smem:[#allocation7_spill]] }
0x1583   : > { %s4571_s20 = sld [smem:[#allocation5_spill]] }
0x1588   : > { %p3569_p4 = scmp.ge.s32.totalorder %s4570_s7, 2 }
0x1589   : > { %s3237_s30 = sand.u32 1, %s4571_s20  }
0x158a   : > { %p3566_p7 = pnand %p3569_p4, %p3968_p6  ;;  %s3238_s8 = scalar_lea.sflag [#allocation3], %s3237_s30 }
0x158c   : > { %p3567_p8 = pneg %p3566_p7 }
0x158e   : > { %3781 = dma.done.wait (%p3567_p8), %s3238_s8, 16  }
0x158f   : > { %3783 = vsyncadd (%p3567_p8), %s3238_s8, 4294967280  ;;  %s4573_s30 = sld [smem:[#allocation8_spill]]  ;;  %s4576_s3 = smov %s3790_s28 }
0x1590   : > { %s4574_s9 = sld [smem:[#allocation6_spill]] }
0x1591   : > { %s4575_s29 = sld [smem:[#allocation9_spill]] }
0x1595   : > { %p32_p9 = scmp.ge.s32.totalorder %s4573_s30, 4  }
0x1596   : > { %s4577_s28 = smov %s4574_s9 }
0x1597   :  { %34 = sbr.rel (!%p32_p9) target bundleno = 16 (0x10), region = 159 }
0x159c   :  { %3243 = vsyncpa [#allocation3], 1 }
0x159d   :  { %3245 = vsyncpa [#allocation3 + $0x1], 1 }

</bundles_post_ra>
